<compile_context>
chip_gen: v5e
topology: v5e:2x2
jax: 0.10.0
libtpu: 0.0.40
codegen_flags: <defaults>
</compile_context>

<pallas_src>
import functools

import jax
import jax.numpy as jnp
from jax.experimental import pallas as pl
from jax.experimental.pallas import tpu as pltpu

LANE = 128
BF16 = jnp.bfloat16
F32 = jnp.float32


def _round_up(x, m):
    return ((x + m - 1) // m) * m


def _pad2d(a, rows, cols):
    """Zero-pad a 2-D array up to (rows, cols)."""
    return jnp.zeros((rows, cols), a.dtype).at[: a.shape[0], : a.shape[1]].set(a)


def _vmem_limit_bytes():
    """Per-generation scoped VMEM limit (half of physical, capped at 64 MiB)."""
    cap = 128 * 1024 * 1024
    try:
        cap = int(getattr(pltpu.get_tpu_info(), "vmem_capacity_bytes", cap))
    except Exception:
        pass
    return int(min(64 * 1024 * 1024, cap // 2))


# ----------------------------------------------------------------------------
# Call A: conv1 -> relu -> dropout -> edge aggregation of conv2 (E2)
# ----------------------------------------------------------------------------
def hgnn_stage1_kernel(
    hl_ref,    # (TN, Mp)  bf16  D^-1*H node tile        (used in phase 1 only)
    hrT_ref,   # (Mp, TN)  bf16  (H*(w*B^-1))^T tile     (both phases)
    x_ref,     # (TN, Fin) bf16  node features           (phase 0 only)
    drop_ref,  # (TN, H1p) bf16  dropout keep/(1-p)      (phase 1 only)
    w1_ref,    # (Fin, H1p) bf16
    b1_ref,    # (1, H1p)   f32
    w2_ref,    # (H1p, Fp)  bf16
    e2_ref,    # OUTPUT (Mp, Fp) f32 : hyperedge embeddings of conv2 (accumulated)
    e1_ref,    # VMEM  (Mp, H1p) f32 : hyperedge embeddings of conv1 (scratch)
):
    phase = pl.program_id(0)
    tile = pl.program_id(1)

    # ---- phase 0: E1 = sum_t HRT_t @ (X_t @ W1) ----
    @pl.when(phase == 0)
    def _():
        @pl.when(tile == 0)
        def _():
            e1_ref[...] = jnp.zeros_like(e1_ref)

        xw1 = jnp.dot(x_ref[...], w1_ref[...], preferred_element_type=F32)
        e1_ref[...] += jnp.dot(
            hrT_ref[...], xw1.astype(BF16), preferred_element_type=F32
        )

    # ---- phase 1: Z1_t = drop * relu(HL_t @ E1 + b1); E2 += HRT_t @ (Z1_t @ W2) ----
    @pl.when(phase == 1)
    def _():
        @pl.when(tile == 0)
        def _():
            e2_ref[...] = jnp.zeros_like(e2_ref)

        y1 = (
            jnp.dot(hl_ref[...], e1_ref[...].astype(BF16), preferred_element_type=F32)
            + b1_ref[...]
        )
        # ReLU + dropout(p=0.3, training=True): one fused multiply with the
        # precomputed bf16 keep/(1-p) mask (promotes to f32).
        z1 = jnp.maximum(y1, 0.0) * drop_ref[...]
        zw2 = jnp.dot(z1.astype(BF16), w2_ref[...], preferred_element_type=F32)
        e2_ref[...] += jnp.dot(
            hrT_ref[...], zw2.astype(BF16), preferred_element_type=F32
        )


# ----------------------------------------------------------------------------
# Call B: node-parallel conv2 gather + LayerNorm  (megacore-friendly)
# ----------------------------------------------------------------------------
def hgnn_stage2_kernel(hl_ref, e2_ref, b2_ref, g_ref, beta_ref, o_ref, *, fout):
    y2 = (
        jnp.dot(hl_ref[...], e2_ref[...].astype(BF16), preferred_element_type=F32)
        + b2_ref[...]
    )
    # Padded columns of y2 are exactly zero (W2/b2 zero-padded); mask anyway.
    col = jax.lax.broadcasted_iota(jnp.int32, y2.shape, 1)
    real = col < fout
    inv_f = jnp.float32(1.0 / fout)
    y2m = jnp.where(real, y2, 0.0)
    mean = jnp.sum(y2m, axis=-1, keepdims=True) * inv_f
    diff = jnp.where(real, y2m - mean, 0.0)
    var = jnp.sum(diff * diff, axis=-1, keepdims=True) * inv_f
    norm = diff * jax.lax.rsqrt(var + jnp.float32(1e-5))
    o_ref[...] = norm * g_ref[...] + beta_ref[...]   # lane-dense (TN, Fp) store


# ----------------------------------------------------------------------------
# Glue
# ----------------------------------------------------------------------------
def _build_propagation(edge_index, edge_attr, num_nodes, num_hyperedges):
    """Densify the incidence and fold the degree normalizations."""
    N, M = num_nodes, num_hyperedges
    H = jnp.zeros((N, M), jnp.float32).at[edge_index[0], edge_index[1]].set(1.0)
    w = edge_attr.astype(jnp.float32)                 # hyperedge weights (M,)
    D = H @ w                                         # node degrees
    D_inv = jnp.where(D > 0, 1.0 / D, 0.0)
    B = jnp.sum(H, axis=0)                            # hyperedge degrees
    B_inv = jnp.where(B > 0, 1.0 / B, 0.0)
    hl = D_inv[:, None] * H                           # (N, M)
    hr = H * (w * B_inv)[None, :]                     # (N, M)
    return hl, hr


@functools.partial(jax.jit, static_argnames=("num_nodes", "num_hyperedges", "tile_n"))
def hypergraph_nn_forward(
    x, edge_index, edge_attr, params, drop_scale,
    *, num_nodes, num_hyperedges, tile_n=256,
):
    N, M = num_nodes, num_hyperedges
    w1, b1, w2, b2, gamma, beta = params
    fin, h1 = w1.shape
    fout = w2.shape[1]

    assert N % tile_n == 0 and tile_n % 128 == 0, "tile_n must divide N, multiple of 128"
    n_tiles = N // tile_n

    # Lane-dense padding of feature dims and sublane padding of hyperedge dim.
    h1p = _round_up(h1, LANE)
    fp = _round_up(fout, LANE)
    mp = _round_up(M, 8)

    hl, hr = _build_propagation(edge_index, edge_attr, N, M)
    hl_b = _pad2d(hl, N, mp).astype(BF16)             # (N, Mp)   bf16
    hrT_b = _pad2d(hr.T, mp, N).astype(BF16)          # (Mp, N)   bf16, pre-transposed

    x_b = x.astype(BF16)
    w1_b = _pad2d(w1, fin, h1p).astype(BF16)
    b1p = _pad2d(b1.reshape(1, -1).astype(F32), 1, h1p)
    w2_b = _pad2d(w2, h1p, fp).astype(BF16)
    b2p = _pad2d(b2.reshape(1, -1).astype(F32), 1, fp)
    gp = _pad2d(gamma.reshape(1, -1).astype(F32), 1, fp)
    betap = _pad2d(beta.reshape(1, -1).astype(F32), 1, fp)
    drop_b = _pad2d(drop_scale, N, h1p).astype(BF16)

    vmem_limit = _vmem_limit_bytes()

    # ---------------- Call A: E2 = sum_t HRT_t @ (Z1_t @ W2) ----------------
    # Phase-aware index maps: pin the block index when an input is unused in a
    # phase so Pallas skips the redundant DMA (consecutive equal indices).
    in_specs_a = [
        pl.BlockSpec((tile_n, mp), lambda p, t: (t * p, 0)),        # hl: phase 1 only
        pl.BlockSpec((mp, tile_n), lambda p, t: (0, t)),            # hrT: both phases
        pl.BlockSpec((tile_n, fin), lambda p, t: (t * (1 - p), 0)), # x: phase 0 only
        pl.BlockSpec((tile_n, h1p), lambda p, t: (t * p, 0)),       # drop: phase 1 only
        pl.BlockSpec((fin, h1p), lambda p, t: (0, 0)),              # w1 (resident)
        pl.BlockSpec((1, h1p), lambda p, t: (0, 0)),                # b1
        pl.BlockSpec((h1p, fp), lambda p, t: (0, 0)),               # w2
    ]
    flops_a = 2 * N * (fin * h1p + 2 * mp * h1p + h1p * fp + mp * fp)
    bytes_a = (
        2 * (N * mp * 2)            # hrT read in both phases (bf16)
        + N * mp * 2                # hl (phase 1)
        + N * fin * 2               # x (phase 0)
        + N * h1p * 2               # dropout mask (phase 1)
        + fin * h1p * 2 + h1p * fp * 2 + h1p * 4
        + mp * fp * 4               # E2 writeback (once)
    )

    e2 = pl.pallas_call(
        hgnn_stage1_kernel,
        out_shape=jax.ShapeDtypeStruct((mp, fp), F32),
        grid_spec=pltpu.PrefetchScalarGridSpec(
            num_scalar_prefetch=0,
            grid=(2, n_tiles),                       # (phase, node tile); phase outermost
            in_specs=in_specs_a,
            out_specs=pl.BlockSpec((mp, fp), lambda p, t: (0, 0)),  # resident accumulator
            scratch_shapes=[pltpu.VMEM((mp, h1p), F32)],            # E1 accumulator
        ),
        compiler_params=pltpu.CompilerParams(
            dimension_semantics=("arbitrary", "arbitrary"),
            vmem_limit_bytes=vmem_limit,
        ),
        cost_estimate=pl.CostEstimate(
            flops=flops_a, transcendentals=0, bytes_accessed=bytes_a
        ),
    )(hl_b, hrT_b, x_b, drop_b, w1_b, b1p, w2_b)

    # ---------------- Call B: Y_t = LayerNorm(HL_t @ E2 + b2) ----------------
    flops_b = 2 * N * mp * fp + 10 * N * fp
    bytes_b = N * mp * 2 + mp * fp * 4 + 3 * fp * 4 + N * fp * 4

    out_padded = pl.pallas_call(
        functools.partial(hgnn_stage2_kernel, fout=fout),
        out_shape=jax.ShapeDtypeStruct((N, fp), F32),
        grid_spec=pltpu.PrefetchScalarGridSpec(
            num_scalar_prefetch=0,
            grid=(n_tiles,),
            in_specs=[
                pl.BlockSpec((tile_n, mp), lambda t: (t, 0)),   # hl node tile
                pl.BlockSpec((mp, fp), lambda t: (0, 0)),       # E2 (resident)
                pl.BlockSpec((1, fp), lambda t: (0, 0)),        # b2
                pl.BlockSpec((1, fp), lambda t: (0, 0)),        # gamma
                pl.BlockSpec((1, fp), lambda t: (0, 0)),        # beta
            ],
            out_specs=pl.BlockSpec((tile_n, fp), lambda t: (t, 0)),
        ),
        compiler_params=pltpu.CompilerParams(
            dimension_semantics=("parallel",),       # node tiles split across TCs (v7x)
            vmem_limit_bytes=vmem_limit,
        ),
        cost_estimate=pl.CostEstimate(
            flops=flops_b, transcendentals=N, bytes_accessed=bytes_b
        ),
    )(hl_b, e2, b2p, gp, betap)

    return out_padded[:, :fout]


def init_params(key, input_dim, hidden_dim1, output_dim):
    """Deterministic synthetic initialization (matches module shapes)."""
    k1, k2, k3, k4 = jax.random.split(key, 4)
    w1 = jax.random.normal(k1, (input_dim, hidden_dim1), F32) * 0.1
    b1 = jax.random.normal(k2, (hidden_dim1,), F32) * 0.01
    w2 = jax.random.normal(k3, (hidden_dim1, output_dim), F32) * 0.1
    b2 = jax.random.normal(k4, (output_dim,), F32) * 0.01
    gamma = jnp.ones((output_dim,), F32)              # nn.LayerNorm defaults
    beta = jnp.zeros((output_dim,), F32)
    return (w1, b1, w2, b2, gamma, beta)


def _reference_forward(x, hl, hr, drop_scale, params):
    """Pure-JAX reference mirroring the kernel's bf16 operand quantization."""
    w1, b1, w2, b2, gamma, beta = params
    x_b, hl_b, hr_b = x.astype(BF16), hl.astype(BF16), hr.astype(BF16)
    w1_b, w2_b, drop_b = w1.astype(BF16), w2.astype(BF16), drop_scale.astype(BF16)

    xw1 = jnp.dot(x_b, w1_b, preferred_element_type=F32)
    e1 = jnp.dot(hr_b.T, xw1.astype(BF16), preferred_element_type=F32)
    y1 = jnp.dot(hl_b, e1.astype(BF16), preferred_element_type=F32) + b1
    z1 = jnp.maximum(y1, 0.0) * drop_b
    zw2 = jnp.dot(z1.astype(BF16), w2_b, preferred_element_type=F32)
    e2 = jnp.dot(hr_b.T, zw2.astype(BF16), preferred_element_type=F32)
    y2 = jnp.dot(hl_b, e2.astype(BF16), preferred_element_type=F32) + b2
    mean = jnp.mean(y2, axis=-1, keepdims=True)
    var = jnp.mean((y2 - mean) ** 2, axis=-1, keepdims=True)
    return (y2 - mean) * jax.lax.rsqrt(var + 1e-5) * gamma + beta


if __name__ == "__main__":
    # Small, module-consistent shapes (node tiles are 128-wide, padded feature
    # dims are lane-dense).
    N = 256           # nodes
    M = 16            # hyperedges
    INPUT_DIM = 32
    HIDDEN_DIM1 = 64
    OUTPUT_DIM = 16
    P_DROP = 0.3
    TILE_N = 128

    key = jax.random.PRNGKey(0)
    kx, ke, kw, kp, kd = jax.random.split(key, 5)

    # Node features.
    x = jax.random.normal(kx, (N, INPUT_DIM), F32)

    # (node, hyperedge) incidence pairs: each node joins 2 hyperedges.
    nodes = jnp.repeat(jnp.arange(N, dtype=jnp.int32), 2)
    hyperedges = jax.random.randint(ke, (2 * N,), 0, M, dtype=jnp.int32)
    edge_index = jnp.stack([nodes, hyperedges], axis=0)        # (2, 2N)

    # Per-hyperedge weights (data.edge_attr -> hyperedge_weight).
    edge_attr = jax.random.uniform(kw, (M,), F32, 0.5, 1.5)

    params = init_params(kp, INPUT_DIM, HIDDEN_DIM1, OUTPUT_DIM)

    # F.dropout(..., 0.3, training=True): precomputed keep-mask scaled by 1/(1-p).
    # TODO(synk): in-kernel pltpu.prng_* mask generation would remove this stream
    # entirely once the seed can be delivered via scalar prefetch.
    keep = jax.random.bernoulli(kd, 1.0 - P_DROP, (N, HIDDEN_DIM1))
    drop_scale = keep.astype(F32) / (1.0 - P_DROP)

    out = hypergraph_nn_forward(
        x, edge_index, edge_attr, params, drop_scale,
        num_nodes=N, num_hyperedges=M, tile_n=TILE_N,
    )
    out = jax.block_until_ready(out)

    # Correctness check against a pure-JAX reference (same dropout mask / casts).
    hl, hr = _build_propagation(edge_index, edge_attr, N, M)
    ref = _reference_forward(x, hl, hr, drop_scale, params)

    assert out.shape == (N, OUTPUT_DIM)
    assert bool(jnp.all(jnp.isfinite(out)))
    assert bool(jnp.allclose(out, ref, atol=2e-2, rtol=2e-2))
    print("KERNEL_OK")
</pallas_src>

<mosaic_0001>
module attributes {stable_mosaic.version = 11 : i64} {
  func.func @hgnn_stage1_kernel(%arg0: i32, %arg1: i32, %arg2: memref<128x16xbf16, #tpu.memory_space<vmem>>, %arg3: memref<16x128xbf16, #tpu.memory_space<vmem>>, %arg4: memref<128x32xbf16, #tpu.memory_space<vmem>>, %arg5: memref<128x128xbf16, #tpu.memory_space<vmem>>, %arg6: memref<32x128xbf16, #tpu.memory_space<vmem>>, %arg7: memref<1x128xf32, #tpu.memory_space<vmem>>, %arg8: memref<128x128xbf16, #tpu.memory_space<vmem>>, %arg9: memref<16x128xf32, #tpu.memory_space<vmem>>, %arg10: memref<16x128xf32, #tpu.memory_space<vmem>>) attributes {dimension_semantics = [#tpu.dimension_semantics<arbitrary>, #tpu.dimension_semantics<arbitrary>], iteration_bounds = array<i64: 2, 2>, scalar_prefetch = 0 : i64, scratch_operands = 1 : i64, tpu.core_type = #tpu.core_type<tc>, window_params = [{transform_indices = @transform_0, window_bounds = array<i64: 128, 16>}, {transform_indices = @transform_1, window_bounds = array<i64: 16, 128>}, {transform_indices = @transform_2, window_bounds = array<i64: 128, 32>}, {transform_indices = @transform_3, window_bounds = array<i64: 128, 128>}, {pipeline_mode = #tpu.pipeline_mode<synchronous>, transform_indices = @transform_4, window_bounds = array<i64: 32, 128>}, {pipeline_mode = #tpu.pipeline_mode<synchronous>, transform_indices = @transform_5, window_bounds = array<i64: 1, 128>}, {pipeline_mode = #tpu.pipeline_mode<synchronous>, transform_indices = @transform_6, window_bounds = array<i64: 128, 128>}, {pipeline_mode = #tpu.pipeline_mode<synchronous>, transform_indices = @transform_7, window_bounds = array<i64: 16, 128>}]} {
    %c0_i32 = arith.constant 0 : i32
    %0 = arith.cmpi eq, %arg0, %c0_i32 : i32
    %1 = arith.extui %0 : i1 to i32
    %c0_i32_0 = arith.constant 0 : i32
    %2 = arith.cmpi ne, %1, %c0_i32_0 : i32
    scf.if %2 {
      %c0_i32_2 = arith.constant 0 : i32
      %6 = arith.cmpi eq, %arg1, %c0_i32_2 : i32
      %7 = arith.extui %6 : i1 to i32
      %c0_i32_3 = arith.constant 0 : i32
      %8 = arith.cmpi ne, %7, %c0_i32_3 : i32
      scf.if %8 {
        %cst_14 = arith.constant 0.000000e+00 : f32
        %18 = vector.broadcast %cst_14 : f32 to vector<16x128xf32>
        %c0_15 = arith.constant 0 : index
        %c0_16 = arith.constant 0 : index
        %19 = vector.load %arg10[%c0_15, %c0_16] : memref<16x128xf32, #tpu.memory_space<vmem>>, vector<16x128xf32>
        tpu.vector_store %arg10[%c0_15, %c0_16], %18 {strides = array<i32>} : memref<16x128xf32, #tpu.memory_space<vmem>>, vector<16x128xf32>,
      } else {
      }
      %c0 = arith.constant 0 : index
      %c0_4 = arith.constant 0 : index
      %9 = vector.load %arg4[%c0, %c0_4] : memref<128x32xbf16, #tpu.memory_space<vmem>>, vector<128x32xbf16>
      %c0_5 = arith.constant 0 : index
      %c0_6 = arith.constant 0 : index
      %10 = vector.load %arg6[%c0_5, %c0_6] : memref<32x128xbf16, #tpu.memory_space<vmem>>, vector<32x128xbf16>
      %cst = arith.constant dense<0.000000e+00> : vector<128x128xf32>
      %11 = tpu.matmul %9, %10, %cst {dimension_numbers = #tpu.dot_dimension_numbers<[1], [0], [0], [1], [0, 0, 1, 1], [], []>} : vector<128x32xbf16>, vector<32x128xbf16>, vector<128x128xf32> -> vector<128x128xf32>
      %c0_7 = arith.constant 0 : index
      %c0_8 = arith.constant 0 : index
      %12 = vector.load %arg10[%c0_7, %c0_8] : memref<16x128xf32, #tpu.memory_space<vmem>>, vector<16x128xf32>
      %c0_9 = arith.constant 0 : index
      %c0_10 = arith.constant 0 : index
      %13 = vector.load %arg3[%c0_9, %c0_10] : memref<16x128xbf16, #tpu.memory_space<vmem>>, vector<16x128xbf16>
      %14 = arith.truncf %11 : vector<128x128xf32> to vector<128x128xbf16>
      %cst_11 = arith.constant dense<0.000000e+00> : vector<16x128xf32>
      %15 = tpu.matmul %13, %14, %cst_11 {dimension_numbers = #tpu.dot_dimension_numbers<[1], [0], [0], [1], [0, 0, 1, 1], [], []>} : vector<16x128xbf16>, vector<128x128xbf16>, vector<16x128xf32> -> vector<16x128xf32>
      %16 = arith.addf %12, %15 : vector<16x128xf32>
      %c0_12 = arith.constant 0 : index
      %c0_13 = arith.constant 0 : index
      %17 = vector.load %arg10[%c0_12, %c0_13] : memref<16x128xf32, #tpu.memory_space<vmem>>, vector<16x128xf32>
      tpu.vector_store %arg10[%c0_12, %c0_13], %16 {strides = array<i32>} : memref<16x128xf32, #tpu.memory_space<vmem>>, vector<16x128xf32>,
    } else {
    }
    %c1_i32 = arith.constant 1 : i32
    %3 = arith.cmpi eq, %arg0, %c1_i32 : i32
    %4 = arith.extui %3 : i1 to i32
    %c0_i32_1 = arith.constant 0 : i32
    %5 = arith.cmpi ne, %4, %c0_i32_1 : i32
    scf.if %5 {
      %c0_i32_2 = arith.constant 0 : i32
      %6 = arith.cmpi eq, %arg1, %c0_i32_2 : i32
      %7 = arith.extui %6 : i1 to i32
      %c0_i32_3 = arith.constant 0 : i32
      %8 = arith.cmpi ne, %7, %c0_i32_3 : i32
      scf.if %8 {
        %cst_22 = arith.constant 0.000000e+00 : f32
        %30 = vector.broadcast %cst_22 : f32 to vector<16x128xf32>
        %c0_23 = arith.constant 0 : index
        %c0_24 = arith.constant 0 : index
        %31 = vector.load %arg9[%c0_23, %c0_24] : memref<16x128xf32, #tpu.memory_space<vmem>>, vector<16x128xf32>
        tpu.vector_store %arg9[%c0_23, %c0_24], %30 {strides = array<i32>} : memref<16x128xf32, #tpu.memory_space<vmem>>, vector<16x128xf32>,
      } else {
      }
      %c0 = arith.constant 0 : index
      %c0_4 = arith.constant 0 : index
      %9 = vector.load %arg2[%c0, %c0_4] : memref<128x16xbf16, #tpu.memory_space<vmem>>, vector<128x16xbf16>
      %c0_5 = arith.constant 0 : index
      %c0_6 = arith.constant 0 : index
      %10 = vector.load %arg10[%c0_5, %c0_6] : memref<16x128xf32, #tpu.memory_space<vmem>>, vector<16x128xf32>
      %11 = arith.truncf %10 : vector<16x128xf32> to vector<16x128xbf16>
      %cst = arith.constant dense<0.000000e+00> : vector<128x128xf32>
      %12 = tpu.matmul %9, %11, %cst {dimension_numbers = #tpu.dot_dimension_numbers<[1], [0], [0], [1], [0, 0, 1, 1], [], []>} : vector<128x16xbf16>, vector<16x128xbf16>, vector<128x128xf32> -> vector<128x128xf32>
      %c0_7 = arith.constant 0 : index
      %c0_8 = arith.constant 0 : index
      %13 = vector.load %arg7[%c0_7, %c0_8] : memref<1x128xf32, #tpu.memory_space<vmem>>, vector<1x128xf32>
      %14 = vector.broadcast %13 : vector<1x128xf32> to vector<128x128xf32>
      %15 = arith.addf %12, %14 : vector<128x128xf32>
      %cst_9 = arith.constant 0.000000e+00 : f32
      %16 = vector.broadcast %cst_9 : f32 to vector<128x128xf32>
      %17 = arith.maximumf %15, %16 : vector<128x128xf32>
      %c0_10 = arith.constant 0 : index
      %c0_11 = arith.constant 0 : index
      %18 = vector.load %arg5[%c0_10, %c0_11] : memref<128x128xbf16, #tpu.memory_space<vmem>>, vector<128x128xbf16>
      %19 = arith.extf %18 : vector<128x128xbf16> to vector<128x128xf32>
      %20 = arith.mulf %17, %19 : vector<128x128xf32>
      %21 = arith.truncf %20 : vector<128x128xf32> to vector<128x128xbf16>
      %c0_12 = arith.constant 0 : index
      %c0_13 = arith.constant 0 : index
      %22 = vector.load %arg8[%c0_12, %c0_13] : memref<128x128xbf16, #tpu.memory_space<vmem>>, vector<128x128xbf16>
      %cst_14 = arith.constant dense<0.000000e+00> : vector<128x128xf32>
      %23 = tpu.matmul %21, %22, %cst_14 {dimension_numbers = #tpu.dot_dimension_numbers<[1], [0], [0], [1], [0, 0, 1, 1], [], []>} : vector<128x128xbf16>, vector<128x128xbf16>, vector<128x128xf32> -> vector<128x128xf32>
      %c0_15 = arith.constant 0 : index
      %c0_16 = arith.constant 0 : index
      %24 = vector.load %arg9[%c0_15, %c0_16] : memref<16x128xf32, #tpu.memory_space<vmem>>, vector<16x128xf32>
      %c0_17 = arith.constant 0 : index
      %c0_18 = arith.constant 0 : index
      %25 = vector.load %arg3[%c0_17, %c0_18] : memref<16x128xbf16, #tpu.memory_space<vmem>>, vector<16x128xbf16>
      %26 = arith.truncf %23 : vector<128x128xf32> to vector<128x128xbf16>
      %cst_19 = arith.constant dense<0.000000e+00> : vector<16x128xf32>
      %27 = tpu.matmul %25, %26, %cst_19 {dimension_numbers = #tpu.dot_dimension_numbers<[1], [0], [0], [1], [0, 0, 1, 1], [], []>} : vector<16x128xbf16>, vector<128x128xbf16>, vector<16x128xf32> -> vector<16x128xf32>
      %28 = arith.addf %24, %27 : vector<16x128xf32>
      %c0_20 = arith.constant 0 : index
      %c0_21 = arith.constant 0 : index
      %29 = vector.load %arg9[%c0_20, %c0_21] : memref<16x128xf32, #tpu.memory_space<vmem>>, vector<16x128xf32>
      tpu.vector_store %arg9[%c0_20, %c0_21], %28 {strides = array<i32>} : memref<16x128xf32, #tpu.memory_space<vmem>>, vector<16x128xf32>,
    } else {
    }
    return
  }
  func.func @transform_0(%arg0: i32, %arg1: i32) -> (i32, i32) {
    %0 = arith.muli %arg1, %arg0 : i32
    %c0_i32 = arith.constant 0 : i32
    %c0_i32_0 = arith.constant 0 : i32
    return %0, %c0_i32 : i32, i32
  }
  func.func @transform_1(%arg0: i32, %arg1: i32) -> (i32, i32) {
    %c0_i32 = arith.constant 0 : i32
    %c0_i32_0 = arith.constant 0 : i32
    return %c0_i32, %arg1 : i32, i32
  }
  func.func @transform_2(%arg0: i32, %arg1: i32) -> (i32, i32) {
    %c1_i32 = arith.constant 1 : i32
    %0 = arith.subi %c1_i32, %arg0 : i32
    %1 = arith.muli %arg1, %0 : i32
    %c0_i32 = arith.constant 0 : i32
    %c0_i32_0 = arith.constant 0 : i32
    return %1, %c0_i32 : i32, i32
  }
  func.func @transform_3(%arg0: i32, %arg1: i32) -> (i32, i32) {
    %0 = arith.muli %arg1, %arg0 : i32
    %c0_i32 = arith.constant 0 : i32
    %c0_i32_0 = arith.constant 0 : i32
    return %0, %c0_i32 : i32, i32
  }
  func.func @transform_4(%arg0: i32, %arg1: i32) -> (i32, i32) {
    %c0_i32 = arith.constant 0 : i32
    %c0_i32_0 = arith.constant 0 : i32
    %c0_i32_1 = arith.constant 0 : i32
    return %c0_i32, %c0_i32_0 : i32, i32
  }
  func.func @transform_5(%arg0: i32, %arg1: i32) -> (i32, i32) {
    %c0_i32 = arith.constant 0 : i32
    %c0_i32_0 = arith.constant 0 : i32
    %c0_i32_1 = arith.constant 0 : i32
    return %c0_i32, %c0_i32_0 : i32, i32
  }
  func.func @transform_6(%arg0: i32, %arg1: i32) -> (i32, i32) {
    %c0_i32 = arith.constant 0 : i32
    %c0_i32_0 = arith.constant 0 : i32
    %c0_i32_1 = arith.constant 0 : i32
    return %c0_i32, %c0_i32_0 : i32, i32
  }
  func.func @transform_7(%arg0: i32, %arg1: i32) -> (i32, i32) {
    %c0_i32 = arith.constant 0 : i32
    %c0_i32_0 = arith.constant 0 : i32
    %c0_i32_1 = arith.constant 0 : i32
    return %c0_i32, %c0_i32_0 : i32, i32
  }
}

module attributes {stable_mosaic.version = 11 : i64} {
  func.func @hgnn_stage2_kernel(%arg0: i32, %arg1: memref<128x16xbf16, #tpu.memory_space<vmem>>, %arg2: memref<16x128xf32, #tpu.memory_space<vmem>>, %arg3: memref<1x128xf32, #tpu.memory_space<vmem>>, %arg4: memref<1x128xf32, #tpu.memory_space<vmem>>, %arg5: memref<1x128xf32, #tpu.memory_space<vmem>>, %arg6: memref<128x128xf32, #tpu.memory_space<vmem>>) attributes {dimension_semantics = [#tpu.dimension_semantics<parallel>], iteration_bounds = array<i64: 2>, scalar_prefetch = 0 : i64, scratch_operands = 0 : i64, tpu.core_type = #tpu.core_type<tc>, window_params = [{transform_indices = @transform_0, window_bounds = array<i64: 128, 16>}, {pipeline_mode = #tpu.pipeline_mode<synchronous>, transform_indices = @transform_1, window_bounds = array<i64: 16, 128>}, {pipeline_mode = #tpu.pipeline_mode<synchronous>, transform_indices = @transform_2, window_bounds = array<i64: 1, 128>}, {pipeline_mode = #tpu.pipeline_mode<synchronous>, transform_indices = @transform_3, window_bounds = array<i64: 1, 128>}, {pipeline_mode = #tpu.pipeline_mode<synchronous>, transform_indices = @transform_4, window_bounds = array<i64: 1, 128>}, {transform_indices = @transform_5, window_bounds = array<i64: 128, 128>}]} {
    %c0 = arith.constant 0 : index
    %c0_0 = arith.constant 0 : index
    %0 = vector.load %arg1[%c0, %c0_0] : memref<128x16xbf16, #tpu.memory_space<vmem>>, vector<128x16xbf16>
    %c0_1 = arith.constant 0 : index
    %c0_2 = arith.constant 0 : index
    %1 = vector.load %arg2[%c0_1, %c0_2] : memref<16x128xf32, #tpu.memory_space<vmem>>, vector<16x128xf32>
    %2 = arith.truncf %1 : vector<16x128xf32> to vector<16x128xbf16>
    %cst = arith.constant dense<0.000000e+00> : vector<128x128xf32>
    %3 = tpu.matmul %0, %2, %cst {dimension_numbers = #tpu.dot_dimension_numbers<[1], [0], [0], [1], [0, 0, 1, 1], [], []>} : vector<128x16xbf16>, vector<16x128xbf16>, vector<128x128xf32> -> vector<128x128xf32>
    %c0_3 = arith.constant 0 : index
    %c0_4 = arith.constant 0 : index
    %4 = vector.load %arg3[%c0_3, %c0_4] : memref<1x128xf32, #tpu.memory_space<vmem>>, vector<1x128xf32>
    %5 = vector.broadcast %4 : vector<1x128xf32> to vector<128x128xf32>
    %6 = arith.addf %3, %5 : vector<128x128xf32>
    %7 = tpu.iota {dimensions = array<i32: 1>} : vector<128x128xi32>
    %c16_i32 = arith.constant 16 : i32
    %8 = vector.broadcast %c16_i32 : i32 to vector<128x128xi32>
    %9 = arith.cmpi slt, %7, %8 : vector<128x128xi32>
    %cst_5 = arith.constant 0.000000e+00 : f32
    %10 = vector.broadcast %cst_5 : f32 to vector<128x128xf32>
    %11 = arith.select %9, %6, %10 : vector<128x128xi1>, vector<128x128xf32>
    %cst_6 = arith.constant dense<0.000000e+00> : vector<128xf32>
    %12 = vector.multi_reduction <add>, %11, %cst_6 [1] : vector<128x128xf32> to vector<128xf32>
    %13 = vector.shape_cast %12 : vector<128xf32> to vector<128x1xf32>
    %cst_7 = arith.constant 6.250000e-02 : f32
    %14 = vector.broadcast %cst_7 : f32 to vector<128x1xf32>
    %15 = arith.mulf %13, %14 : vector<128x1xf32>
    %16 = vector.broadcast %15 : vector<128x1xf32> to vector<128x128xf32>
    %17 = arith.subf %11, %16 : vector<128x128xf32>
    %cst_8 = arith.constant 0.000000e+00 : f32
    %18 = vector.broadcast %cst_8 : f32 to vector<128x128xf32>
    %19 = arith.select %9, %17, %18 : vector<128x128xi1>, vector<128x128xf32>
    %20 = arith.mulf %19, %19 : vector<128x128xf32>
    %cst_9 = arith.constant dense<0.000000e+00> : vector<128xf32>
    %21 = vector.multi_reduction <add>, %20, %cst_9 [1] : vector<128x128xf32> to vector<128xf32>
    %22 = vector.shape_cast %21 : vector<128xf32> to vector<128x1xf32>
    %cst_10 = arith.constant 6.250000e-02 : f32
    %23 = vector.broadcast %cst_10 : f32 to vector<128x1xf32>
    %24 = arith.mulf %22, %23 : vector<128x1xf32>
    %cst_11 = arith.constant 9.99999974E-6 : f32
    %25 = vector.broadcast %cst_11 : f32 to vector<128x1xf32>
    %26 = arith.addf %24, %25 : vector<128x1xf32>
    %27 = math.rsqrt %26 : vector<128x1xf32>
    %28 = vector.broadcast %27 : vector<128x1xf32> to vector<128x128xf32>
    %29 = arith.mulf %19, %28 : vector<128x128xf32>
    %c0_12 = arith.constant 0 : index
    %c0_13 = arith.constant 0 : index
    %30 = vector.load %arg4[%c0_12, %c0_13] : memref<1x128xf32, #tpu.memory_space<vmem>>, vector<1x128xf32>
    %31 = vector.broadcast %30 : vector<1x128xf32> to vector<128x128xf32>
    %32 = arith.mulf %29, %31 : vector<128x128xf32>
    %c0_14 = arith.constant 0 : index
    %c0_15 = arith.constant 0 : index
    %33 = vector.load %arg5[%c0_14, %c0_15] : memref<1x128xf32, #tpu.memory_space<vmem>>, vector<1x128xf32>
    %34 = vector.broadcast %33 : vector<1x128xf32> to vector<128x128xf32>
    %35 = arith.addf %32, %34 : vector<128x128xf32>
    %c0_16 = arith.constant 0 : index
    %c0_17 = arith.constant 0 : index
    %36 = vector.load %arg6[%c0_16, %c0_17] : memref<128x128xf32, #tpu.memory_space<vmem>>, vector<128x128xf32>
    tpu.vector_store %arg6[%c0_16, %c0_17], %35 {strides = array<i32>} : memref<128x128xf32, #tpu.memory_space<vmem>>, vector<128x128xf32>,
    return
  }
  func.func @transform_0(%arg0: i32) -> (i32, i32) {
    %c0_i32 = arith.constant 0 : i32
    %c0_i32_0 = arith.constant 0 : i32
    return %arg0, %c0_i32 : i32, i32
  }
  func.func @transform_1(%arg0: i32) -> (i32, i32) {
    %c0_i32 = arith.constant 0 : i32
    %c0_i32_0 = arith.constant 0 : i32
    %c0_i32_1 = arith.constant 0 : i32
    return %c0_i32, %c0_i32_0 : i32, i32
  }
  func.func @transform_2(%arg0: i32) -> (i32, i32) {
    %c0_i32 = arith.constant 0 : i32
    %c0_i32_0 = arith.constant 0 : i32
    %c0_i32_1 = arith.constant 0 : i32
    return %c0_i32, %c0_i32_0 : i32, i32
  }
  func.func @transform_3(%arg0: i32) -> (i32, i32) {
    %c0_i32 = arith.constant 0 : i32
    %c0_i32_0 = arith.constant 0 : i32
    %c0_i32_1 = arith.constant 0 : i32
    return %c0_i32, %c0_i32_0 : i32, i32
  }
  func.func @transform_4(%arg0: i32) -> (i32, i32) {
    %c0_i32 = arith.constant 0 : i32
    %c0_i32_0 = arith.constant 0 : i32
    %c0_i32_1 = arith.constant 0 : i32
    return %c0_i32, %c0_i32_0 : i32, i32
  }
  func.func @transform_5(%arg0: i32) -> (i32, i32) {
    %c0_i32 = arith.constant 0 : i32
    %c0_i32_0 = arith.constant 0 : i32
    return %arg0, %c0_i32 : i32, i32
  }
}

</mosaic_0001>

<bundles_post_ra>
// kernel: hypergraph_nn_forward.3
= control target key start
LH: loop header
LB: loop body
LE: loop exit
PB: predicated region body
PF: predicated region fallthrough
CT: control target
= control target key end

     0   :  { %s976_s18 = smov 0   ;;  %s1390_s0 = inlined_call_operand.vmem [shape: bf16[256,16], index: 0, kind: input, shape index: {}]   ;;  %s1391_s1 = inlined_call_operand.vmem [shape: f32[16,128], index: 1, kind: input, shape index: {}]   ;;  %s1392_s2 = inlined_call_operand.vmem [shape: f32[1,128], index: 2, kind: input, shape index: {}]   ;;  %s1393_s3 = inlined_call_operand.vmem [shape: f32[1,128], index: 3, kind: input, shape index: {}]   ;;  %s1394_s4 = inlined_call_operand.vmem [shape: f32[1,128], index: 4, kind: input, shape index: {}]   ;;  %s1395_s5 = inlined_call_operand.vmem [shape: f32[256,128], index: 5, kind: output, shape index: {}]  }
   0x1 LB: > { %s833_s19 = sadd.s32 4294967295, %s944_s18   ;;  %p837_p0 = scmp.ge.s32.totalorder %s944_s18, 1  ;;  %s944_s18 = sphi %s976_s18, %s15_s18  }
   0x2   : > { %p188_p1 = scmp.lt.s32.totalorder %s944_s18, 3 }
   0x4   : > { %p189_p2 = pnand %p837_p0, %p188_p1 }
   0x5   : > { %s838_s24 = sshll.u32 (!%p189_p2), %s833_s19, 4 }
   0x6   : > { %192 = sbr.rel (%p189_p2) target bundleno = 469 (0x1d5), region = 40  ;;  %p217_p3 = scmp.lt.s32.totalorder (!%p189_p2), %s838_s24, 31 }
   0xb   : > { %v245_v0 = vld [vmem:[%s1391_s1] sm:$0xff]  ;;  %v246_v1 = vld [vmem:[%s1391_s1 + $0x8] sm:$0xff]  ;;  %s1397_s24 = smov (!%p217_p3, %s838_s24), 31  ;;  %vm292_vm0 = vcmask 130048   ;;  %v366_v11 = vlaneseq }
   0xc   : > { %v247_v2 = vpack.c.bf16 %v246_v1, %v245_v0  ;;  %s839_s25 = sshll.u32 %s1397_s24, 2  ;;  %v1009_v13 = vld [vmem:[%s1392_s2] ss:$0 sm:$0xff]  ;;  %s841_s8 = sshll.u32 %s1397_s24, 3 }
   0xd   : > { %s220_s28 = scalar_lea.vmem %s1390_s0, %s839_s25  ;;  %v1004_v12 = vand.u32 127, %v366_v11  ;;  %s1251_s13 = scalar_lea.vmem %s1395_s5, %s841_s8 }
   0xe   : > { %324 = vmatpush.bf16.msra.mxu0 %v247_v2  ;;  %892 = vmatpush.bf16.msra.mxu1 %v247_v2  ;;  %v884_v3 = vld [vmem:[%s220_s28] sm:$0xff]  ;;  %v886_v4 = vld [vmem:[%s220_s28 + $0x10] sm:$0xff]  ;;  %v885_v7 = vld [vmem:[%s220_s28 + $0x8] sm:$0xff] }
   0xf   : > { %893 = vmatpush.bf16.msra.mxu2 %v247_v2  ;;  %894 = vmatpush.bf16.msra.mxu3 %v247_v2  ;;  %v888_v5 = vld [vmem:[%s220_s28 + $0x20] sm:$0xff]  ;;  %v890_v6 = vld [vmem:[%s220_s28 + $0x30] sm:$0xff]  ;;  %v887_v8 = vld [vmem:[%s220_s28 + $0x18] sm:$0xff]  ;;  %vm368_vm1 = vcmp.lt.s32.totalorder %v1004_v12, 16 }
  0x10   : > { %v889_v9 = vld [vmem:[%s220_s28 + $0x28] sm:$0xff]  ;;  %v891_v10 = vld [vmem:[%s220_s28 + $0x38] sm:$0xff] }
  0x11   : > { %874 = vmatmul.msk.bf16.vlgmr.msra.gmra.mxu0 %vm292_vm0, %v884_v3  ;;  %876 = vmatmul.msk.bf16.vlgmr.msra.gmra.mxu1 %vm292_vm0, %v886_v4 }
  0x12   : > { %878 = vmatmul.msk.bf16.vlgmr.msra.gmra.mxu2 %vm292_vm0, %v888_v5  ;;  %880 = vmatmul.msk.bf16.vlgmr.msra.gmra.mxu3 %vm292_vm0, %v890_v6 }
  0x21   : > { %875 = vmatmul.msk.bf16.gmra.mxu0 %vm292_vm0, %v885_v7  ;;  %877 = vmatmul.msk.bf16.gmra.mxu1 %vm292_vm0, %v887_v8 }
  0x22   : > { %879 = vmatmul.msk.bf16.gmra.mxu2 %vm292_vm0, %v889_v9  ;;  %881 = vmatmul.msk.bf16.gmra.mxu3 %vm292_vm0, %v891_v10 }
  0x8e   : > { %v326_v14 = vpop.f32.mrf.mxu0  ;;  %v336_v15 = vpop.f32.mrf.mxu1 }
  0x8f   : > { %v327_v16 = vadd.f32 %v1009_v13, %v326_v14  ;;  %v337_v17 = vadd.f32 %v1009_v13, %v336_v15 }
  0x91   : > { %v1016_v18 = vsel %vm368_vm1, %v337_v17, 0.0  ;;  %v1020_v19 = vsel %vm368_vm1, %v327_v16, 0.0 }
  0x92   : > { %393 = vadd.xlane.f32.xlu2 %v1016_v18  ;;  %385 = vadd.xlane.f32.xlu0 %v1020_v19 }
  0x95   : > { %v346_v20 = vpop.f32.mrf.mxu2  ;;  %v356_v21 = vpop.f32.mrf.mxu3 }
  0x96   : > { %v347_v22 = vadd.f32 %v1009_v13, %v346_v20  ;;  %v357_v23 = vadd.f32 %v1009_v13, %v356_v21  ;;  %v328_v24 = vpop.f32.mrf.mxu0  ;;  %v338_v27 = vpop.f32.mrf.mxu1 }
  0x97   : > { %v329_v28 = vadd.f32 %v1009_v13, %v328_v24  ;;  %v339_v29 = vadd.f32 %v1009_v13, %v338_v27 }
  0x98   : > { %v1028_v25 = vsel %vm368_vm1, %v347_v22, 0.0  ;;  %v1032_v26 = vsel %vm368_vm1, %v357_v23, 0.0 }
  0x99   : > { %v1046_v35 = vsel %vm368_vm1, %v339_v29, 0.0  ;;  %v1050_v36 = vsel %vm368_vm1, %v329_v28, 0.0 }
  0x9a   : > { %401 = vadd.xlane.f32.xlu2 %v1028_v25  ;;  %409 = vadd.xlane.f32.xlu0 %v1032_v26 }
  0x9d   : > { %v348_v30 = vpop.f32.mrf.mxu2  ;;  %v358_v31 = vpop.f32.mrf.mxu3 }
  0x9e   : > { %v359_v32 = vadd.f32 %v1009_v13, %v358_v31  ;;  %v331_v34 = vpop.f32.mrf.mxu0  ;;  %v349_v38 = vadd.f32 %v1009_v13, %v348_v30  ;;  %v341_v44 = vpop.f32.mrf.mxu1 }
  0x9f   : > { %v332_v37 = vadd.f32 %v1009_v13, %v331_v34  ;;  %v342_v45 = vadd.f32 %v1009_v13, %v341_v44 }
  0xa0   : > { %v1041_v33 = vsel %vm368_vm1, %v359_v32, 0.0  ;;  %v1063_v42 = vsel %vm368_vm1, %v349_v38, 0.0 }
  0xa1   : > { %411 = vadd.xlane.f32.xlu1 %v1041_v33  ;;  %v1058_v40 = vsel %vm368_vm1, %v332_v37, 0.0  ;;  %v1075_v49 = vsel %vm368_vm1, %v342_v45, 0.0 }
  0xa2   : > { %395 = vadd.xlane.f32.xlu2 %v1046_v35  ;;  %387 = vadd.xlane.f32.xlu0 %v1050_v36 }
  0xa5   : > { %v351_v39 = vpop.f32.mrf.mxu2  ;;  %v361_v41 = vpop.f32.mrf.mxu3 }
  0xa6   : > { %v352_v43 = vadd.f32 %v1009_v13, %v351_v39  ;;  %v333_v52 = vpop.f32.mrf.mxu0  ;;  %v362_v53 = vadd.f32 %v1009_v13, %v361_v41  ;;  %v343_v59 = vpop.f32.mrf.mxu1 }
  0xa7   : > { %v334_v55 = vadd.f32 %v1009_v13, %v333_v52  ;;  %v344_v60 = vadd.f32 %v1009_v13, %v343_v59 }
  0xa8   : > { %v1071_v48 = vsel %vm368_vm1, %v352_v43, 0.0  ;;  %v1089_v56 = vsel %vm368_vm1, %v362_v53, 0.0 }
  0xa9   : > { %389 = vadd.xlane.f32.xlu1 %v1058_v40  ;;  %v1097_v58 = vsel %vm368_vm1, %v334_v55, 0.0  ;;  %v1105_v61 = vsel %vm368_vm1, %v344_v60, 0.0 }
  0xaa   : > { %403 = vadd.xlane.f32.xlu0 %v1063_v42 }
  0xad   : > { %v353_v46 = vpop.f32.mrf.mxu2  ;;  %v363_v51 = vpop.f32.mrf.mxu3 }
  0xae   : > { %v354_v47 = vadd.f32 %v1009_v13, %v353_v46  ;;  %v364_v54 = vadd.f32 %v1009_v13, %v363_v51 }
  0xb0   : > { %v1079_v50 = vsel %vm368_vm1, %v354_v47, 0.0  ;;  %v1093_v57 = vsel %vm368_vm1, %v364_v54, 0.0 }
  0xb1   : > { %407 = vadd.xlane.f32.xlu2 %v1079_v50  ;;  %405 = vadd.xlane.f32.xlu1 %v1071_v48 }
  0xb2   : > { %397 = vadd.xlane.f32.xlu0 %v1075_v49 }
  0xb9   : > { %413 = vadd.xlane.f32.xlu2 %v1089_v56  ;;  %391 = vadd.xlane.f32.xlu1 %v1097_v58 }
  0xba   : > { %415 = vadd.xlane.f32.xlu0 %v1093_v57 }
  0xc1   : > { %399 = vadd.xlane.f32.xlu1 %v1105_v61 }
 0x105   : > { %v394_v62 = vpop.xlane.xlu2 %393  ;;  %v386_v63 = vpop.xlane.xlu0 %385 }
 0x106   : > { %v421_v0 = vmul.f32 0.0625, %v394_v62  ;;  %v417_v1 = vmul.f32 0.0625, %v386_v63 }
 0x108   : > { %v437_v2 = vsub.f32 %v1016_v18, %v421_v0  ;;  %v433_v3 = vsub.f32 %v1020_v19, %v417_v1 }
 0x10a   : > { %v1112_v4 = vsel %vm368_vm1, %v437_v2, 0.0  ;;  %v1116_v5 = vsel %vm368_vm1, %v433_v3, 0.0 }
 0x10b   : > { %v469_v6 = vmul.f32 %v1112_v4, %v1112_v4  ;;  %v465_v7 = vmul.f32 %v1116_v5, %v1116_v5 }
 0x10d   : > { %489 = vadd.xlane.f32.xlu2 %v469_v6  ;;  %v402_v8 = vpop.xlane.xlu2 %401  ;;  %481 = vadd.xlane.f32.xlu1 %v465_v7  ;;  %v410_v9 = vpop.xlane.xlu0 %409 }
 0x10e   : > { %v425_v10 = vmul.f32 0.0625, %v402_v8  ;;  %v429_v11 = vmul.f32 0.0625, %v410_v9 }
 0x110   : > { %v441_v13 = vsub.f32 %v1028_v25, %v425_v10  ;;  %v445_v14 = vsub.f32 %v1032_v26, %v429_v11 }
 0x112   : > { %v1126_v15 = vsel %vm368_vm1, %v441_v13, 0.0  ;;  %v1130_v16 = vsel %vm368_vm1, %v445_v14, 0.0 }
 0x113   : > { %v473_v17 = vmul.f32 %v1126_v15, %v1126_v15  ;;  %v477_v18 = vmul.f32 %v1130_v16, %v1130_v16 }
 0x114   : > { %v412_v19 = vpop.xlane.xlu1 %411 }
 0x115   : > { %v396_v20 = vpop.xlane.xlu2 %395  ;;  %497 = vadd.xlane.f32.xlu0 %v473_v17  ;;  %505 = vadd.xlane.f32.xlu1 %v477_v18  ;;  %v388_v21 = vpop.xlane.xlu0 %387 }
 0x116   : > { %v422_v22 = vmul.f32 0.0625, %v396_v20  ;;  %v418_v23 = vmul.f32 0.0625, %v388_v21 }
 0x118   : > { %v438_v24 = vsub.f32 %v1046_v35, %v422_v22  ;;  %v434_v25 = vsub.f32 %v1050_v36, %v418_v23 }
 0x11a   : > { %v1140_v26 = vsel %vm368_vm1, %v438_v24, 0.0  ;;  %v1144_v27 = vsel %vm368_vm1, %v434_v25, 0.0 }
 0x11b   : > { %v470_v28 = vmul.f32 %v1140_v26, %v1140_v26  ;;  %v466_v29 = vmul.f32 %v1144_v27, %v1144_v27 }
 0x11c   : > { %v390_v30 = vpop.xlane.xlu1 %389 }
 0x11d   : > { %v419_v31 = vmul.f32 0.0625, %v390_v30  ;;  %491 = vadd.xlane.f32.xlu0 %v470_v28  ;;  %483 = vadd.xlane.f32.xlu2 %v466_v29  ;;  %v404_v32 = vpop.xlane.xlu0 %403 }
 0x11e   : > { %v426_v34 = vmul.f32 0.0625, %v404_v32 }
 0x11f   : > { %v435_v35 = vsub.f32 %v1058_v40, %v419_v31 }
 0x120   : > { %v442_v36 = vsub.f32 %v1063_v42, %v426_v34 }
 0x121   : > { %v1154_v37 = vsel %vm368_vm1, %v435_v35, 0.0 }
 0x122   : > { %v1158_v38 = vsel %vm368_vm1, %v442_v36, 0.0  ;;  %v467_v39 = vmul.f32 %v1154_v37, %v1154_v37 }
 0x123   : > { %v474_v41 = vmul.f32 %v1158_v38, %v1158_v38 }
 0x124   : > { %v408_v43 = vpop.xlane.xlu2 %407  ;;  %v406_v44 = vpop.xlane.xlu1 %405 }
 0x125   : > { %v428_v45 = vmul.f32 0.0625, %v408_v43  ;;  %v427_v40 = vmul.f32 0.0625, %v406_v44  ;;  %485 = vadd.xlane.f32.xlu0 %v467_v39  ;;  %499 = vadd.xlane.f32.xlu1 %v474_v41  ;;  %v398_v42 = vpop.xlane.xlu0 %397 }
 0x126   : > { %v423_v46 = vmul.f32 0.0625, %v398_v42 }
 0x127   : > { %v444_v47 = vsub.f32 %v1079_v50, %v428_v45  ;;  %v443_v51 = vsub.f32 %v1071_v48, %v427_v40 }
 0x128   : > { %v439_v52 = vsub.f32 %v1075_v49, %v423_v46 }
 0x129   : > { %v1169_v53 = vsel %vm368_vm1, %v443_v51, 0.0  ;;  %v1173_v54 = vsel %vm368_vm1, %v444_v47, 0.0 }
 0x12a   : > { %v475_v55 = vmul.f32 %v1169_v53, %v1169_v53  ;;  %v1179_v59 = vsel %vm368_vm1, %v439_v52, 0.0  ;;  %v476_v48 = vmul.f32 %v1173_v54, %v1173_v54 }
 0x12b   : > { %v471_v49 = vmul.f32 %v1179_v59, %v1179_v59 }
 0x12c   : > { %v414_v50 = vpop.xlane.xlu2 %413  ;;  %v392_v60 = vpop.xlane.xlu1 %391  ;;  %501 = vadd.xlane.f32.xlu2 %v475_v55 }
 0x12d   : > { %v431_v62 = vmul.f32 0.0625, %v414_v50  ;;  %v420_v63 = vmul.f32 0.0625, %v392_v60  ;;  %503 = vadd.xlane.f32.xlu0 %v476_v48  ;;  %493 = vadd.xlane.f32.xlu1 %v471_v49  ;;  %v416_v0 = vpop.xlane.xlu0 %415 }
 0x12e   : > { %v432_v3 = vmul.f32 0.0625, %v416_v0 }
 0x12f   : > { %v447_v1 = vsub.f32 %v1089_v56, %v431_v62  ;;  %v436_v2 = vsub.f32 %v1097_v58, %v420_v63  ;;  %v430_v58 = vmul.f32 0.0625, %v412_v19  ;;  %v1234_v63 = vld [vmem:[%s1393_s3] ss:$0 sm:$0xff] }
 0x130   : > { %v448_v10 = vsub.f32 %v1093_v57, %v432_v3 }
 0x131   : > { %v1189_v6 = vsel %vm368_vm1, %v447_v1, 0.0  ;;  %v1193_v7 = vsel %vm368_vm1, %v436_v2, 0.0  ;;  %v446_v57 = vsub.f32 %v1041_v33, %v430_v58 }
 0x132   : > { %v479_v8 = vmul.f32 %v1189_v6, %v1189_v6  ;;  %v468_v9 = vmul.f32 %v1193_v7, %v1193_v7  ;;  %v1203_v14 = vsel %vm368_vm1, %v448_v10, 0.0 }
 0x133   : > { %v480_v20 = vmul.f32 %v1203_v14, %v1203_v14 }
 0x134   : > { %v400_v56 = vpop.xlane.xlu1 %399 }
 0x135   : > { %v424_v11 = vmul.f32 0.0625, %v400_v56  ;;  %509 = vadd.xlane.f32.xlu0 %v479_v8  ;;  %487 = vadd.xlane.f32.xlu1 %v468_v9  ;;  %v1243_v8 = vld [vmem:[%s1394_s4] ss:$0 sm:$0xff] }
 0x137   : > { %v440_v13 = vsub.f32 %v1105_v61, %v424_v11  ;;  %v1216_v61 = vsel %vm368_vm1, %v446_v57, 0.0 }
 0x138   : > { %v478_v19 = vmul.f32 %v1216_v61, %v1216_v61 }
 0x139   : > { %v1207_v17 = vsel %vm368_vm1, %v440_v13, 0.0 }
 0x13a   : > { %v472_v18 = vmul.f32 %v1207_v17, %v1207_v17 }
 0x13c   : > { %495 = vadd.xlane.f32.xlu2 %v472_v18 }
 0x13d   : > { %511 = vadd.xlane.f32.xlu1 %v480_v20 }
 0x144   : > { %507 = vadd.xlane.f32.xlu2 %v478_v19 }
 0x180   : > { %v490_v21 = vpop.xlane.xlu2 %489  ;;  %v482_v22 = vpop.xlane.xlu1 %481 }
 0x181   : > { %v517_v23 = vmul.f32 0.0625, %v490_v21  ;;  %v513_v24 = vmul.f32 0.0625, %v482_v22 }
 0x183   : > { %v533_v25 = vadd.f32 1e-05, %v517_v23  ;;  %v529_v28 = vadd.f32 1e-05, %v513_v24 }
 0x185   : > { %906 = vrsqrt.f32 %v533_v25  ;;  %vm591_vm4 = vweird.f32 %v533_v25  ;;  %vm551_vm6 = vweird.f32 %v529_v28 }
 0x186   : > { %908 = vrsqrt.f32 %v529_v28 }
 0x188   : > { %v506_v33 = vpop.xlane.xlu1 %505  ;;  %v498_v29 = vpop.xlane.xlu0 %497 }
 0x189   : > { %v525_v30 = vmul.f32 0.0625, %v506_v33  ;;  %v521_v31 = vmul.f32 0.0625, %v498_v29 }
 0x18b   : > { %v907_v32 = vpop.eup %906  ;;  %v1220_v12 = vadd.f32 1e-05, %v525_v30  ;;  %v1222_v34 = vadd.f32 1e-05, %v521_v31 }
 0x18c   : > { %v909_v35 = vpop.eup %908  ;;  %v586_v36 = vmul.f32 %v907_v32, %v533_v25  ;;  %vm592_vm2 = vweird.f32 %v907_v32 }
 0x18d   : > { %v546_v39 = vmul.f32 %v909_v35, %v529_v28  ;;  %910 = vrsqrt.f32 %v1220_v12  ;;  %vm552_vm3 = vweird.f32 %v909_v35  ;;  %vm593_vm5 = vmor %vm591_vm4, %vm592_vm2  ;;  %vm671_vm10 = vweird.f32 %v1220_v12 }
 0x18e   : > { %v587_v41 = vmul.f32 %v907_v32, %v586_v36  ;;  %912 = vrsqrt.f32 %v1222_v34  ;;  %vm553_vm7 = vmor %vm551_vm6, %vm552_vm3  ;;  %vm631_vm12 = vweird.f32 %v1222_v34 }
 0x18f   : > { %v547_v43 = vmul.f32 %v909_v35, %v546_v39 }
 0x190   : > { %v588_v44 = vmul.f32 0.5, %v587_v41  ;;  %v484_v45 = vpop.xlane.xlu2 %483  ;;  %v492_v40 = vpop.xlane.xlu0 %491 }
 0x191   : > { %v548_v42 = vmul.f32 0.5, %v547_v43  ;;  %v514_v46 = vmul.f32 0.0625, %v484_v45  ;;  %v518_v47 = vmul.f32 0.0625, %v492_v40 }
 0x192   : > { %v589_v51 = vsub.f32 1.5, %v588_v44 }
 0x193   : > { %v911_v52 = vpop.eup %910  ;;  %v549_v55 = vsub.f32 1.5, %v548_v42  ;;  %v1226_v48 = vadd.f32 1e-05, %v514_v46  ;;  %v1228_v49 = vadd.f32 1e-05, %v518_v47 }
 0x194   : > { %v913_v50 = vpop.eup %912  ;;  %v590_v60 = vmul.f32 %v907_v32, %v589_v51  ;;  %v666_v62 = vmul.f32 %v911_v52, %v1220_v12  ;;  %vm672_vm8 = vweird.f32 %v911_v52 }
 0x195   : > { %v550_v0 = vmul.f32 %v909_v35, %v549_v55  ;;  %v626_v1 = vmul.f32 %v913_v50, %v1222_v34  ;;  %914 = vrsqrt.f32 %v1226_v48  ;;  %vm632_vm9 = vweird.f32 %v913_v50  ;;  %vm673_vm11 = vmor %vm671_vm10, %vm672_vm8 }
 0x196   : > { %v594_v2 = vsel %vm593_vm5, %v907_v32, %v590_v60  ;;  %v667_v3 = vmul.f32 %v911_v52, %v666_v62  ;;  %916 = vrsqrt.f32 %v1228_v49  ;;  %vm633_vm13 = vmor %vm631_vm12, %vm632_vm9  ;;  %vm561_vm14 = vweird.f32 %v1226_v48 }
 0x197   : > { %v709_v9 = vmul.f32 %v594_v2, %v1112_v4  ;;  %v554_v10 = vsel %vm553_vm7, %v909_v35, %v550_v0  ;;  %v627_v56 = vmul.f32 %v913_v50, %v626_v1  ;;  %vm601_vm2 = vweird.f32 %v1228_v49 }
 0x198   : > { %v705_v11 = vmul.f32 %v554_v10, %v1116_v5  ;;  %v668_v58 = vmul.f32 0.5, %v667_v3  ;;  %v500_v13 = vpop.xlane.xlu1 %499  ;;  %v486_v18 = vpop.xlane.xlu0 %485 }
 0x199   : > { %v729_v57 = vmul.f32 %v1234_v63, %v709_v9  ;;  %v628_v20 = vmul.f32 0.5, %v627_v56  ;;  %v522_v19 = vmul.f32 0.0625, %v500_v13  ;;  %v515_v21 = vmul.f32 0.0625, %v486_v18 }
 0x19a   : > { %v725_v4 = vmul.f32 %v1234_v63, %v705_v11  ;;  %v669_v22 = vsub.f32 1.5, %v668_v58 }
 0x19b   : > { %v915_v5 = vpop.eup %914  ;;  %v749_v23 = vadd.f32 %v1243_v8, %v729_v57  ;;  %v629_v24 = vsub.f32 1.5, %v628_v20  ;;  %v1255_v25 = vadd.f32 1e-05, %v522_v19  ;;  %v1257_v28 = vadd.f32 1e-05, %v515_v21 }
 0x19c   : > { %v917_v33 = vpop.eup %916  ;;  %v745_v29 = vadd.f32 %v1243_v8, %v725_v4  ;;  %v670_v30 = vmul.f32 %v911_v52, %v669_v22  ;;  %v556_v31 = vmul.f32 %v915_v5, %v1226_v48  ;;  %vm562_vm15 = vweird.f32 %v915_v5 }
 0x19d   : > { %765 = vst [vmem:[%s1251_s13 + $0x20] sm:$0xff] %v749_v23  ;;  %v630_v32 = vmul.f32 %v913_v50, %v629_v24  ;;  %v596_v35 = vmul.f32 %v917_v33, %v1228_v49  ;;  %918 = vrsqrt.f32 %v1255_v25  ;;  %vm602_vm0 = vweird.f32 %v917_v33  ;;  %vm563_vm1 = vmor %vm561_vm14, %vm562_vm15 }
 0x19e   : > { %761 = vst [vmem:[%s1251_s13] sm:$0xff] %v745_v29  ;;  %v674_v36 = vsel %vm673_vm11, %v911_v52, %v670_v30  ;;  %v557_v39 = vmul.f32 %v915_v5, %v556_v31  ;;  %920 = vrsqrt.f32 %v1257_v28  ;;  %vm603_vm3 = vmor %vm601_vm2, %vm602_vm0  ;;  %vm641_vm6 = vweird.f32 %v1255_v25 }
 0x19f   : > { %v717_v12 = vmul.f32 %v674_v36, %v1130_v16  ;;  %v634_v41 = vsel %vm633_vm13, %v913_v50, %v630_v32  ;;  %v597_v43 = vmul.f32 %v917_v33, %v596_v35  ;;  %v502_v44 = vpop.xlane.xlu2 %501  ;;  %vm571_vm8 = vweird.f32 %v1257_v28 }
 0x1a0   : > { %v713_v45 = vmul.f32 %v634_v41, %v1126_v15  ;;  %v558_v40 = vmul.f32 0.5, %v557_v39  ;;  %v523_v34 = vmul.f32 0.0625, %v502_v44  ;;  %v494_v42 = vpop.xlane.xlu1 %493  ;;  %v504_v46 = vpop.xlane.xlu0 %503 }
 0x1a1   : > { %v737_v47 = vmul.f32 %v1234_v63, %v717_v12  ;;  %v598_v51 = vmul.f32 0.5, %v597_v43  ;;  %v519_v52 = vmul.f32 0.0625, %v494_v42  ;;  %v524_v55 = vmul.f32 0.0625, %v504_v46 }
 0x1a2   : > { %v733_v60 = vmul.f32 %v1234_v63, %v713_v45  ;;  %v559_v16 = vsub.f32 1.5, %v558_v40  ;;  %v1274_v50 = vadd.f32 1e-05, %v523_v34 }
 0x1a3   : > { %v919_v62 = vpop.eup %918  ;;  %v757_v15 = vadd.f32 %v1243_v8, %v737_v47  ;;  %v599_v0 = vsub.f32 1.5, %v598_v51  ;;  %v1277_v1 = vadd.f32 1e-05, %v519_v52  ;;  %v1281_v56 = vadd.f32 1e-05, %v524_v55 }
 0x1a4   : > { %v921_v2 = vpop.eup %920  ;;  %v753_v3 = vadd.f32 %v1243_v8, %v733_v60  ;;  %v560_v9 = vmul.f32 %v915_v5, %v559_v16  ;;  %v636_v10 = vmul.f32 %v919_v62, %v1255_v25  ;;  %922 = vrsqrt.f32 %v1274_v50 }
 0x1a5   : > { %773 = vst [vmem:[%s1251_s13 + $0x60] sm:$0xff] %v757_v15  ;;  %v600_v11 = vmul.f32 %v917_v33, %v599_v0  ;;  %v566_v58 = vmul.f32 %v921_v2, %v1257_v28  ;;  %924 = vrsqrt.f32 %v1277_v1  ;;  %vm642_vm4 = vweird.f32 %v919_v62 }
 0x1a6   : > { %769 = vst [vmem:[%s1251_s13 + $0x40] sm:$0xff] %v753_v3  ;;  %v564_v13 = vsel %vm563_vm1, %v915_v5, %v560_v9  ;;  %v637_v18 = vmul.f32 %v919_v62, %v636_v10  ;;  %926 = vrsqrt.f32 %v1281_v56  ;;  %vm572_vm5 = vweird.f32 %v921_v2  ;;  %vm643_vm7 = vmor %vm641_vm6, %vm642_vm4 }
 0x1a7   : > { %v706_v57 = vmul.f32 %v564_v13, %v1144_v27  ;;  %v604_v20 = vsel %vm603_vm3, %v917_v33, %v600_v11  ;;  %v567_v19 = vmul.f32 %v921_v2, %v566_v58  ;;  %vm573_vm9 = vmor %vm571_vm8, %vm572_vm5  ;;  %vm651_vm10 = vweird.f32 %v1274_v50 }
 0x1a8   : > { %v710_v48 = vmul.f32 %v604_v20, %v1140_v26  ;;  %v638_v21 = vmul.f32 0.5, %v637_v18  ;;  %v488_v49 = vpop.xlane.xlu1 %487  ;;  %v510_v4 = vpop.xlane.xlu0 %509  ;;  %vm611_vm11 = vweird.f32 %v1277_v1  ;;  %vm661_vm1 = vweird.f32 %v1281_v56 }
 0x1a9   : > { %v726_v22 = vmul.f32 %v1234_v63, %v706_v57  ;;  %v568_v23 = vmul.f32 0.5, %v567_v19  ;;  %v516_v5 = vmul.f32 0.0625, %v488_v49  ;;  %v527_v24 = vmul.f32 0.0625, %v510_v4 }
 0x1aa   : > { %v730_v29 = vmul.f32 %v1234_v63, %v710_v48  ;;  %v639_v30 = vsub.f32 1.5, %v638_v21  ;;  %v1297_v27 = vpop.eup %922 }
 0x1ab   : > { %v746_v26 = vadd.f32 %v1243_v8, %v726_v22  ;;  %v569_v33 = vsub.f32 1.5, %v568_v23  ;;  %v1300_v31 = vadd.f32 1e-05, %v516_v5  ;;  %v1302_v32 = vadd.f32 1e-05, %v527_v24  ;;  %v1304_v35 = vpop.eup %924 }
 0x1ac   : > { %v750_v36 = vadd.f32 %v1243_v8, %v730_v29  ;;  %v640_v39 = vmul.f32 %v919_v62, %v639_v30  ;;  %v646_v12 = vmul.f32 %v1297_v27, %v1274_v50  ;;  %v606_v43 = vmul.f32 %v1304_v35, %v1277_v1  ;;  %v927_v44 = vpop.eup %926 }
 0x1ad   : > { %762 = vst [vmem:[%s1251_s13 + $0x8] sm:$0xff] %v746_v26  ;;  %v570_v41 = vmul.f32 %v921_v2, %v569_v33  ;;  %928 = vrsqrt.f32 %v1300_v31  ;;  %v656_v28 = vmul.f32 %v927_v44, %v1281_v56  ;;  %vm652_vm12 = vweird.f32 %v1297_v27 }
 0x1ae   : > { %766 = vst [vmem:[%s1251_s13 + $0x28] sm:$0xff] %v750_v36  ;;  %v644_v45 = vsel %vm643_vm7, %v919_v62, %v640_v39  ;;  %v647_v25 = vmul.f32 %v1297_v27, %v646_v12  ;;  %930 = vrsqrt.f32 %v1302_v32  ;;  %v607_v42 = vmul.f32 %v1304_v35, %v606_v43  ;;  %vm653_vm14 = vmor %vm651_vm10, %vm652_vm12 }
 0x1af   : > { %v714_v40 = vmul.f32 %v644_v45, %v1158_v38  ;;  %v574_v34 = vsel %vm573_vm9, %v921_v2, %v570_v41  ;;  %v496_v46 = vpop.xlane.xlu2 %495  ;;  %v657_v60 = vmul.f32 %v927_v44, %v656_v28  ;;  %vm612_vm13 = vweird.f32 %v1304_v35 }
 0x1b0   : > { %v707_v47 = vmul.f32 %v574_v34, %v1154_v37  ;;  %v648_v51 = vmul.f32 0.5, %v647_v25  ;;  %v608_v55 = vmul.f32 0.5, %v607_v42  ;;  %v520_v16 = vmul.f32 0.0625, %v496_v46  ;;  %v512_v38 = vpop.xlane.xlu1 %511  ;;  %vm613_vm0 = vmor %vm611_vm11, %vm612_vm13 }
 0x1b1   : > { %v734_v52 = vmul.f32 %v1234_v63, %v714_v40  ;;  %v658_v3 = vmul.f32 0.5, %v657_v60  ;;  %v528_v18 = vmul.f32 0.0625, %v512_v38  ;;  %vm662_vm15 = vweird.f32 %v927_v44 }
 0x1b2   : > { %v727_v62 = vmul.f32 %v1234_v63, %v707_v47  ;;  %v649_v15 = vsub.f32 1.5, %v648_v51  ;;  %v609_v2 = vsub.f32 1.5, %v608_v55  ;;  %v1330_v9 = vadd.f32 1e-05, %v520_v16  ;;  %vm663_vm2 = vmor %vm661_vm1, %vm662_vm15 }
 0x1b3   : > { %v929_v37 = vpop.eup %928  ;;  %v754_v0 = vadd.f32 %v1243_v8, %v734_v52  ;;  %v659_v20 = vsub.f32 1.5, %v658_v3  ;;  %v544_v29 = vadd.f32 1e-05, %v528_v18  ;;  %vm581_vm5 = vweird.f32 %v1300_v31 }
 0x1b4   : > { %v931_v10 = vpop.eup %930  ;;  %v747_v11 = vadd.f32 %v1243_v8, %v727_v62  ;;  %v650_v58 = vmul.f32 %v1297_v27, %v649_v15  ;;  %v576_v13 = vmul.f32 %v929_v37, %v1300_v31  ;;  %v610_v57 = vmul.f32 %v1304_v35, %v609_v2 }
 0x1b5   : > { %770 = vst [vmem:[%s1251_s13 + $0x48] sm:$0xff] %v754_v0  ;;  %v686_v19 = vmul.f32 %v931_v10, %v1302_v32  ;;  %932 = vrsqrt.f32 %v1330_v9  ;;  %v660_v4 = vmul.f32 %v927_v44, %v659_v20  ;;  %vm582_vm3 = vweird.f32 %v929_v37 }
 0x1b6   : > { %763 = vst [vmem:[%s1251_s13 + $0x10] sm:$0xff] %v747_v11  ;;  %v654_v48 = vsel %vm653_vm14, %v1297_v27, %v650_v58  ;;  %v577_v21 = vmul.f32 %v929_v37, %v576_v13  ;;  %v614_v49 = vsel %vm613_vm0, %v1304_v35, %v610_v57  ;;  %934 = vrsqrt.f32 %v544_v29  ;;  %vm583_vm6 = vmor %vm581_vm5, %vm582_vm3 }
 0x1b7   : > { %v715_v50 = vmul.f32 %v654_v48, %v1169_v53  ;;  %v687_v22 = vmul.f32 %v931_v10, %v686_v19  ;;  %v508_v23 = vpop.xlane.xlu2 %507  ;;  %v711_v5 = vmul.f32 %v614_v49, %v1179_v59  ;;  %v664_v27 = vsel %vm663_vm2, %v927_v44, %v660_v4 }
 0x1b8   : > { %v578_v24 = vmul.f32 0.5, %v577_v21  ;;  %v526_v30 = vmul.f32 0.0625, %v508_v23  ;;  %v716_v53 = vmul.f32 %v664_v27, %v1173_v54  ;;  %vm692_vm4 = vweird.f32 %v931_v10 }
 0x1b9   : > { %v735_v1 = vmul.f32 %v1234_v63, %v715_v50  ;;  %v688_v56 = vmul.f32 0.5, %v687_v22  ;;  %v731_v26 = vmul.f32 %v1234_v63, %v711_v5  ;;  %vm691_vm7 = vweird.f32 %v1302_v32 }
 0x1ba   : > { %v579_v33 = vsub.f32 1.5, %v578_v24  ;;  %v542_v36 = vadd.f32 1e-05, %v526_v30  ;;  %v736_v41 = vmul.f32 %v1234_v63, %v716_v53  ;;  %vm693_vm8 = vmor %vm691_vm7, %vm692_vm4  ;;  %vm621_vm10 = vweird.f32 %v1330_v9 }
 0x1bb   : > { %v755_v35 = vadd.f32 %v1243_v8, %v735_v1  ;;  %v689_v59 = vsub.f32 1.5, %v688_v56  ;;  %v933_v39 = vpop.eup %932  ;;  %v751_v12 = vadd.f32 %v1243_v8, %v731_v26  ;;  %vm701_vm13 = vweird.f32 %v544_v29 }
 0x1bc   : > { %v580_v43 = vmul.f32 %v929_v37, %v579_v33  ;;  %v616_v44 = vmul.f32 %v933_v39, %v1330_v9  ;;  %936 = vrsqrt.f32 %v542_v36  ;;  %v756_v45 = vadd.f32 %v1243_v8, %v736_v41  ;;  %v935_v42 = vpop.eup %934 }
 0x1bd   : > { %771 = vst [vmem:[%s1251_s13 + $0x50] sm:$0xff] %v755_v35  ;;  %v690_v54 = vmul.f32 %v931_v10, %v689_v59  ;;  %v696_v47 = vmul.f32 %v935_v42, %v544_v29  ;;  %vm622_vm9 = vweird.f32 %v933_v39  ;;  %vm702_vm12 = vweird.f32 %v935_v42 }
 0x1be   : > { %767 = vst [vmem:[%s1251_s13 + $0x30] sm:$0xff] %v751_v12  ;;  %v584_v25 = vsel %vm583_vm6, %v929_v37, %v580_v43  ;;  %v617_v31 = vmul.f32 %v933_v39, %v616_v44  ;;  %vm623_vm11 = vmor %vm621_vm10, %vm622_vm9  ;;  %vm681_vm0 = vweird.f32 %v542_v36 }
 0x1bf   : > { %v708_v40 = vmul.f32 %v584_v25, %v1193_v7  ;;  %v694_v34 = vsel %vm693_vm8, %v931_v10, %v690_v54  ;;  %772 = vst [vmem:[%s1251_s13 + $0x58] sm:$0xff] %v756_v45  ;;  %v697_v7 = vmul.f32 %v935_v42, %v696_v47  ;;  %vm703_vm14 = vmor %vm701_vm13, %vm702_vm12 }
 0x1c0   : > { %v719_v28 = vmul.f32 %v694_v34, %v1189_v6  ;;  %v618_v46 = vmul.f32 0.5, %v617_v31 }
 0x1c1   : > { %v728_v32 = vmul.f32 %v1234_v63, %v708_v40  ;;  %v698_v6 = vmul.f32 0.5, %v697_v7 }
 0x1c2   : > { %v739_v51 = vmul.f32 %v1234_v63, %v719_v28  ;;  %v937_v52 = vpop.eup %936  ;;  %v619_v60 = vsub.f32 1.5, %v618_v46 }
 0x1c3   : > { %v748_v55 = vadd.f32 %v1243_v8, %v728_v32  ;;  %v676_v38 = vmul.f32 %v937_v52, %v542_v36  ;;  %v699_v0 = vsub.f32 1.5, %v698_v6  ;;  %vm682_vm15 = vweird.f32 %v937_v52 }
 0x1c4   : > { %v759_v16 = vadd.f32 %v1243_v8, %v739_v51  ;;  %v620_v62 = vmul.f32 %v933_v39, %v619_v60  ;;  %vm683_vm1 = vmor %vm681_vm0, %vm682_vm15 }
 0x1c5   : > { %764 = vst [vmem:[%s1251_s13 + $0x18] sm:$0xff] %v748_v55  ;;  %v677_v15 = vmul.f32 %v937_v52, %v676_v38  ;;  %v700_v10 = vmul.f32 %v935_v42, %v699_v0 }
 0x1c6   : > { %775 = vst [vmem:[%s1251_s13 + $0x70] sm:$0xff] %v759_v16  ;;  %v624_v37 = vsel %vm623_vm11, %v933_v39, %v620_v62 }
 0x1c7   : > { %v712_v2 = vmul.f32 %v624_v37, %v1207_v17  ;;  %v678_v3 = vmul.f32 0.5, %v677_v15  ;;  %v704_v9 = vsel %vm703_vm14, %v935_v42, %v700_v10 }
 0x1c8   : > { %v720_v18 = vmul.f32 %v704_v9, %v1203_v14 }
 0x1c9   : > { %v732_v11 = vmul.f32 %v1234_v63, %v712_v2  ;;  %v679_v58 = vsub.f32 1.5, %v678_v3 }
 0x1ca   : > { %v740_v17 = vmul.f32 %v1234_v63, %v720_v18 }
 0x1cb   : > { %v752_v13 = vadd.f32 %v1243_v8, %v732_v11  ;;  %v680_v57 = vmul.f32 %v937_v52, %v679_v58 }
 0x1cc   : > { %v760_v48 = vadd.f32 %v1243_v8, %v740_v17 }
 0x1cd   : > { %768 = vst [vmem:[%s1251_s13 + $0x38] sm:$0xff] %v752_v13  ;;  %v684_v20 = vsel %vm683_vm1, %v937_v52, %v680_v57 }
 0x1ce   : > { %v718_v19 = vmul.f32 %v684_v20, %v1216_v61  ;;  %776 = vst [vmem:[%s1251_s13 + $0x78] sm:$0xff] %v760_v48 }
 0x1d0   : > { %v738_v21 = vmul.f32 %v1234_v63, %v718_v19 }
 0x1d2   : > { %v758_v50 = vadd.f32 %v1243_v8, %v738_v21 }
 0x1d4   : > { %774 = vst [vmem:[%s1251_s13 + $0x68] sm:$0xff] %v758_v50 }
 0x1d5 PF: > { %s15_s18 = sadd.s32 1, %s944_s18  }
 0x1d6   : > { %p12_p4 = scmp.ge.s32.totalorder %s15_s18, 4  }
 0x1d8   :  { %14 = sbr.rel (!%p12_p4) target bundleno = 1 (0x1), region = 70 }

// kernel: hypergraph_nn_forward.2
= control target key start
LH: loop header
LB: loop body
LE: loop exit
PB: predicated region body
PF: predicated region fallthrough
CT: control target
= control target key end

     0   :  { %s1655_s0 = inlined_call_operand.vmem [shape: bf16[256,16], index: 0, kind: input, shape index: {}]   ;;  %s1656_s1 = inlined_call_operand.vmem [shape: bf16[16,256], index: 1, kind: input, shape index: {}]   ;;  %s1657_s2 = inlined_call_operand.vmem [shape: bf16[256,32], index: 2, kind: input, shape index: {}]   ;;  %s1658_s3 = inlined_call_operand.vmem [shape: bf16[256,128], index: 3, kind: input, shape index: {}]   ;;  %s1659_s4 = inlined_call_operand.vmem [shape: bf16[32,128], index: 4, kind: input, shape index: {}]   ;;  %s1660_s5 = inlined_call_operand.vmem [shape: f32[1,128], index: 5, kind: input, shape index: {}]   ;;  %s1661_s6 = inlined_call_operand.vmem [shape: bf16[128,128], index: 6, kind: input, shape index: {}]   ;;  %s1662_s7 = inlined_call_operand.vmem [shape: f32[16,128], index: 7, kind: output, shape index: {}]  }
   0x1   :  { %1663 = sst [smem:[#allocation4_spill]] %s1656_s1 }
   0x2   :  { %s1443_s24 = smov 0   ;;  %s1445_s25 = smov 0  }
   0x3   :  { %s1447_s26 = smov 0   ;;  %s1449_s27 = smov 0  }
   0x4   :  { %s1451_s28 = smov 0   ;;  %s1453_s29 = smov 0  }
   0x5   :  { %s1455_s30 = smov 0  }
   0x6 LB: > { %s26_s8 = sadd.s32 1, %s1391_s28  ;;  %s29_s9 = sadd.s32 1, %s1395_s29  ;;  %s1399_s30 = sphi %s1455_s30, %s17_s30   ;;  %s1395_s29 = sphi %s1453_s29, %s1670_s29   ;;  %s1391_s28 = sphi %s1451_s28, %s1669_s28   ;;  %s1387_s27 = sphi %s1449_s27, %s1668_s27   ;;  %s1383_s26 = sphi %s1447_s26, %s1667_s26   ;;  %s1379_s25 = sphi %s1445_s25, %s1666_s25   ;;  %s1375_s24 = sphi %s1443_s24, %s1665_s24  }
   0x7   : > { %p27_p0 = scmp.ge.s32.totalorder %s26_s8, 2  ;;  %s64_s10 = sadd.s32 1, %s1379_s25 }
   0x8   : > { %p71_p1 = scmp.ne.s32.totalorder %s1379_s25, %s1375_s24  ;;  %p72_p2 = scmp.eq.s32.totalorder %s1399_s30, 0 }
   0x9   : > { %s1672_s8 = smov (%p27_p0, %s26_s8), 0  ;;  %s1674_s9 = smov (!%p27_p0, %s29_s9), %s1395_s29 }
   0xa   : > { %s61_s11 = ssub.s32 %s1391_s28, %s1672_s8  ;;  %p73_p3 = por %p72_p2, %p71_p1 }
   0xb   : > { %p31_p4 = scmp.ge.s32.totalorder %s1674_s9, 2  ;;  %p62_p5 = scmp.eq.s32.totalorder %s61_s11, 0 }
   0xc   : > { %p1061_p6 = scmp.ge.s32.totalorder %s1399_s30, 4 }
   0xd   : > { %s1676_s9 = smov (%p31_p4, %s1674_s9), 0 }
   0xe   : > { %s1492_s12 = scalar_select %p62_p5, %s1379_s25, %s64_s10  }
   0xf   : > { %248 = sbr.rel (%p1061_p6) target bundleno = 32 (0x20), region = 28 }
  0x14   : > { %262 = sbr.rel (!%p73_p3) target bundleno = 32 (0x20), region = 36  ;;  %s264_s13 = sand.u32 (%p73_p3), 1, %s1379_s25  }
  0x15   : > { %s1063_s14 = sshll.u32 (%p73_p3), %s1391_s28, 2  ;;  %s1062_s15 = sshll.u32 (%p73_p3), %s264_s13, 3 }
  0x16   : > { %s1664_s1 = sld [smem:[#allocation4_spill]] (%p73_p3)  ;;  %s266_s19 = scalar_lea.vmem (%p73_p3), [#allocation3], %s1062_s15 }
  0x1c   : > { %s268_s18 = scalar_lea.vmem %s1664_s1, %s1063_s14 }
  0x1d   : > { %v285_v0 = vld [vmem:[%s268_s18] sm:$0xf]  ;;  %v287_v1 = vld [vmem:[%s268_s18 + $0x8] sm:$0xf] }
  0x1e   : > { %286 = vst [vmem:[%s266_s19] sm:$0xf] %v285_v0 }
  0x1f   : > { %288 = vst [vmem:[%s266_s19 + $0x4] sm:$0xf] %v287_v1 }
  0x20 PF: > { %p1064_p7 = scmp.ge.s32.totalorder %s1399_s30, 1  ;;  %p339_p8 = scmp.lt.s32.totalorder %s1399_s30, 5 }
  0x22   : > { %p340_p9 = pnand %p1064_p7, %p339_p8 }
  0x23   : > { %s346_s20 = sand.u32 (!%p340_p9), 1, %s1375_s24   ;;  %s391_s21 = smul.u32 (!%p340_p9), %s1383_s26, %s1387_s27 }
  0x24   : > { %343 = sbr.rel (%p340_p9) target bundleno = 988 (0x3dc), region = 85  ;;  %s1505_s22 = sshll.u32 (!%p340_p9), %s346_s20, 3 }
  0x25   : > { %s399_s23 = ssub.s32 (!%p340_p9), 1, %s1387_s27  ;;  %s1066_s10 = sshll.u32 (!%p340_p9), %s391_s21, 4 }
  0x26   : > { %p393_p10 = scmp.lt.s32.totalorder (!%p340_p9), %s1066_s10, 31  ;;  %s400_s11 = smul.u32 (!%p340_p9), %s1383_s26, %s399_s23 }
  0x27   : > { %p1072_p12 = scmp.ne.s32.totalorder (!%p340_p9), %s1387_s27, 0 }
  0x28   : > { %s1068_s13 = sshll.u32 (!%p340_p9), %s400_s11, 4  ;;  %s348_s11 = scalar_lea.vmem (!%p340_p9), [#allocation3], %s1505_s22 }
  0x29   : > { %s1678_s10 = smov (!%p393_p10, %s1066_s10), 31  ;;  %p402_p11 = scmp.lt.s32.totalorder %s1068_s13, 31 }
  0x2a   : > { %s1067_s14 = sshll.u32 %s1678_s10, 2  ;;  %421 = sbr.rel (%p1072_p12) target bundleno = 397 (0x18d), region = 93 }
  0x2b   : > { %s1512_s17 = scalar_lea.vmem %s1655_s0, %s1067_s14  ;;  %s1517_s24 = scalar_lea.vmem %s1658_s3, %s1067_s14 }
  0x2c   : > { %s1680_s13 = smov (!%p402_p11, %s1068_s13), 31  ;;  %p1073_p13 = scmp.ne.s32.totalorder (!%p1072_p12), %s1383_s26, 0 }
  0x2d   : > { %s1069_s20 = sshll.u32 %s1680_s13, 2 }
  0x2e   : > { %s1522_s23 = scalar_lea.vmem %s1657_s2, %s1069_s20 }
  0x2f   : > { %425 = sbr.rel (%p1073_p13) target bundleno = 55 (0x37), region = 97 }
  0x34   : > { %v1401_v2 = vmov 0.0  }
  0x35   : > { %426 = vst [vmem:[#allocation2] sm:$0xff] %v1401_v2 }
  0x36   : > { %427 = vst [vmem:[#allocation2 + $0x8] sm:$0xff] %v1401_v2 }
  0x37 PF: > { %v1215_v3 = vld [vmem:[%s1659_s4 + $0x8] sm:$0xff]  ;;  %v1214_v4 = vld [vmem:[%s1659_s4] sm:$0xff]  ;;  %v1209_v5 = vld [vmem:[%s1522_s23 + $0x18] sm:$0xff]  ;;  %vm500_vm0 = vcmask 261120  }
  0x38   : > { %1273 = vmatpush.bf16.msra.mxu2 %v1215_v3  ;;  %1274 = vmatpush.bf16.msra.mxu3 %v1215_v3  ;;  %v1212_v6 = vld [vmem:[%s1522_s23 + $0x30] sm:$0xff]  ;;  %v1206_v7 = vld [vmem:[%s1522_s23] sm:$0xff]  ;;  %v1213_v9 = vld [vmem:[%s1522_s23 + $0x38] sm:$0xff] }
  0x39   : > { %531 = vmatpush.bf16.msra.mxu0 %v1215_v3  ;;  %v1210_v8 = vld [vmem:[%s1522_s23 + $0x20] sm:$0xff]  ;;  %v1207_v10 = vld [vmem:[%s1522_s23 + $0x8] sm:$0xff]  ;;  %v1208_v12 = vld [vmem:[%s1522_s23 + $0x10] sm:$0xff] }
  0x3a   : > { %v1211_v11 = vld [vmem:[%s1522_s23 + $0x28] sm:$0xff]  ;;  %v1216_v37 = vld [vmem:[%s348_s11] sm:$0xff] }
  0x3c   : > { %1275 = vmatpush.bf16.msra.mxu2 %v1214_v4  ;;  %1276 = vmatpush.bf16.msra.mxu3 %v1214_v4  ;;  %v574_v38 = vld [vmem:[#allocation2] sm:$0xff] }
  0x3d   : > { %532 = vmatpush.bf16.msra.mxu0 %v1214_v4  ;;  %v575_v41 = vld [vmem:[#allocation2 + $0x8] sm:$0xff] }
  0x3f   : > { %1117 = vmatmul.msk.bf16.vlgmr.msra.gmra.mxu2 %vm500_vm0, %v1209_v5  ;;  %1120 = vmatmul.msk.bf16.vlgmr.msra.gmra.mxu3 %vm500_vm0, %v1212_v6 }
  0x40   : > { %1114 = vmatmul.msk.bf16.vlgmr.msra.gmra.mxu0 %vm500_vm0, %v1206_v7 }
  0x4f   : > { %1118 = vmatmul.msk.bf16.gmra.mxu2 %vm500_vm0, %v1210_v8  ;;  %1121 = vmatmul.msk.bf16.gmra.mxu3 %vm500_vm0, %v1213_v9 }
  0x50   : > { %1115 = vmatmul.msk.bf16.gmra.mxu0 %vm500_vm0, %v1207_v10 }
  0x5f   : > { %1119 = vmatmul.msk.bf16.gmra.mxu2 %vm500_vm0, %v1211_v11 }
  0x60   : > { %1116 = vmatmul.msk.bf16.gmra.mxu0 %vm500_vm0, %v1208_v12 }
  0xbd   : > { %v534_v13 = vpop.f32.mrf.mxu0 }
  0xc2   : > { %v549_v14 = vpop.f32.mrf.mxu2  ;;  %v564_v15 = vpop.f32.mrf.mxu3 }
  0xc5   : > { %v536_v18 = vpop.f32.mrf.mxu0 }
  0xc6   : > { %v578_v36 = vpack.c.bf16 %v536_v18, %v534_v13 }
  0xca   : > { %v551_v16 = vpop.f32.mrf.mxu2  ;;  %v566_v17 = vpop.f32.mrf.mxu3 }
  0xcb   : > { %v584_v25 = vpack.c.bf16 %v566_v17, %v564_v15  ;;  %v581_v32 = vpack.c.bf16 %v551_v16, %v549_v14 }
  0xcd   : > { %v539_v21 = vpop.f32.mrf.mxu0 }
  0xd2   : > { %v554_v19 = vpop.f32.mrf.mxu2  ;;  %v569_v20 = vpop.f32.mrf.mxu3 }
  0xd5   : > { %v541_v26 = vpop.f32.mrf.mxu0 }
  0xd6   : > { %v579_v35 = vpack.c.bf16 %v541_v26, %v539_v21 }
  0xda   : > { %v556_v22 = vpop.f32.mrf.mxu2  ;;  %v571_v23 = vpop.f32.mrf.mxu3 }
  0xdb   : > { %v585_v24 = vpack.c.bf16 %v571_v23, %v569_v20  ;;  %v582_v31 = vpack.c.bf16 %v556_v22, %v554_v19 }
  0xdd   : > { %592 = vmatpush.bf16.msra.mxu1 %v585_v24  ;;  %v544_v28 = vpop.f32.mrf.mxu0 }
  0xe1   : > { %593 = vmatpush.bf16.msra.mxu1 %v584_v25 }
  0xe2   : > { %v559_v27 = vpop.f32.mrf.mxu2 }
  0xe5   : > { %v546_v33 = vpop.f32.mrf.mxu0 }
  0xe6   : > { %v580_v34 = vpack.c.bf16 %v546_v33, %v544_v28 }
  0xea   : > { %v561_v29 = vpop.f32.mrf.mxu2 }
  0xeb   : > { %v583_v30 = vpack.c.bf16 %v561_v29, %v559_v27 }
  0xed   : > { %594 = vmatpush.bf16.msra.mxu1 %v583_v30 }
  0xf1   : > { %595 = vmatpush.bf16.msra.mxu1 %v582_v31 }
  0xf5   : > { %596 = vmatpush.bf16.msra.mxu1 %v581_v32 }
  0xf9   : > { %597 = vmatpush.bf16.msra.mxu1 %v580_v34 }
  0xfd   : > { %598 = vmatpush.bf16.msra.mxu1 %v579_v35 }
 0x101   : > { %599 = vmatpush.bf16.msra.mxu1 %v578_v36 }
 0x104   : > { %600 = vmatmul.bf16.vlgmr.msra.gmra.mxu1 %v1216_v37 }
 0x181   : > { %v601_v39 = vpop.f32.mrf.mxu1 }
 0x182   : > { %v606_v40 = vadd.f32 %v601_v39, %v574_v38 }
 0x184   : > { %608 = vst [vmem:[#allocation2] sm:$0xff] %v606_v40 }
 0x189   : > { %v603_v42 = vpop.f32.mrf.mxu1 }
 0x18a   : > { %v607_v43 = vadd.f32 %v603_v42, %v575_v41 }
 0x18c   : > { %609 = vst [vmem:[#allocation2 + $0x8] sm:$0xff] %v607_v43 }
 0x18d PF: > { %p1126_p0 = scmp.ne.s32.totalorder %s1387_s27, 1 }
 0x18e   : > { %p1127_p1 = scmp.ne.s32.totalorder (!%p1126_p0), %s1383_s26, 0 }
 0x18f   : > { %613 = sbr.rel (%p1126_p0) target bundleno = 988 (0x3dc), region = 101 }
 0x194   : > { %617 = sbr.rel (%p1127_p1) target bundleno = 412 (0x19c), region = 105 }
 0x199   : > { %v1402_v44 = vmov 0.0  }
 0x19a   : > { %618 = vst [vmem:[%s1662_s7] sm:$0xff] %v1402_v44 }
 0x19b   : > { %619 = vst [vmem:[%s1662_s7 + $0x8] sm:$0xff] %v1402_v44 }
 0x19c PF: > { %v636_v45 = vld [vmem:[#allocation2] sm:$0xff]  ;;  %v637_v46 = vld [vmem:[#allocation2 + $0x8] sm:$0xff]  ;;  %vm683_vm1 = vcmask 130048   ;;  %v1219_v50 = vld [vmem:[%s1512_s17 + $0x10] sm:$0xff] }
 0x19d   : > { %v638_v47 = vpack.c.bf16 %v637_v46, %v636_v45  ;;  %v1217_v48 = vld [vmem:[%s1512_s17] sm:$0xff]  ;;  %v1218_v49 = vld [vmem:[%s1512_s17 + $0x8] sm:$0xff]  ;;  %v1220_v51 = vld [vmem:[%s1512_s17 + $0x18] sm:$0xff] }
 0x19e   : > { %v1223_v52 = vld [vmem:[%s1512_s17 + $0x30] sm:$0xff]  ;;  %v1232_v53 = vld [vmem:[%s1661_s6 + $0x38] sm:$0xff]  ;;  %v1230_v55 = vld [vmem:[%s1661_s6 + $0x28] sm:$0xff] }
 0x19f   : > { %715 = vmatpush.bf16.msra.mxu0 %v638_v47  ;;  %1277 = vmatpush.bf16.msra.mxu2 %v638_v47  ;;  %v1231_v54 = vld [vmem:[%s1661_s6 + $0x30] sm:$0xff]  ;;  %v1229_v56 = vld [vmem:[%s1661_s6 + $0x20] sm:$0xff]  ;;  %v1224_v58 = vld [vmem:[%s1512_s17 + $0x38] sm:$0xff] }
 0x1a0   : > { %893 = vmatpush.bf16.msra.mxu1 %v1232_v53  ;;  %1278 = vmatpush.bf16.msra.mxu3 %v1232_v53  ;;  %v1221_v57 = vld [vmem:[%s1512_s17 + $0x20] sm:$0xff]  ;;  %v1222_v59 = vld [vmem:[%s1512_s17 + $0x28] sm:$0xff]  ;;  %v1228_v60 = vld [vmem:[%s1661_s6 + $0x18] sm:$0xff] }
 0x1a1   : > { %v1227_v61 = vld [vmem:[%s1661_s6 + $0x10] sm:$0xff]  ;;  %v1226_v62 = vld [vmem:[%s1661_s6 + $0x8] sm:$0xff]  ;;  %v1225_v63 = vld [vmem:[%s1661_s6] sm:$0xff] }
 0x1a2   : > { %1160 = vmatmul.msk.bf16.vlgmr.msra.gmra.mxu0 %vm683_vm1, %v1217_v48  ;;  %1166 = vmatmul.msk.bf16.vlgmr.msra.gmra.mxu2 %vm683_vm1, %v1223_v52  ;;  %v1594_v1 = vld [vmem:[%s1660_s5] ss:$0 sm:$0xff]  ;;  %v1266_v15 = vld [vmem:[%s1517_s24 + $0x8] sm:$0xff]   ;;  %v1267_v27 = vld [vmem:[%s1517_s24 + $0x10] sm:$0xff]  }
 0x1a3   : > { %v1235_v3 = vld [vmem:[%s1517_s24] sm:$0xff]   ;;  %v1240_v18 = vunpack.c.l.bf16 %v1266_v15  ;;  %v1241_v20 = vunpack.c.h.bf16 %v1266_v15  ;;  %v1244_v30 = vunpack.c.l.bf16 %v1267_v27  ;;  %v1245_v32 = vunpack.c.h.bf16 %v1267_v27  ;;  %v1268_v39 = vld [vmem:[%s1517_s24 + $0x18] sm:$0xff]  }
 0x1a4   : > { %894 = vmatpush.bf16.msra.mxu1 %v1231_v54  ;;  %1279 = vmatpush.bf16.msra.mxu3 %v1231_v54  ;;  %v1236_v6 = vunpack.c.l.bf16 %v1235_v3  ;;  %v1237_v8 = vunpack.c.h.bf16 %v1235_v3  ;;  %v1248_v42 = vunpack.c.l.bf16 %v1268_v39  ;;  %v1249_v44 = vunpack.c.h.bf16 %v1268_v39 }
 0x1a8   : > { %895 = vmatpush.bf16.msra.mxu1 %v1230_v55  ;;  %1280 = vmatpush.bf16.msra.mxu3 %v1230_v55 }
 0x1ac   : > { %896 = vmatpush.bf16.msra.mxu1 %v1229_v56  ;;  %1281 = vmatpush.bf16.msra.mxu3 %v1229_v56 }
 0x1b0   : > { %897 = vmatpush.bf16.msra.mxu1 %v1228_v60  ;;  %1282 = vmatpush.bf16.msra.mxu3 %v1228_v60 }
 0x1b2   : > { %1161 = vmatmul.msk.bf16.gmra.mxu0 %vm683_vm1, %v1218_v49  ;;  %1167 = vmatmul.msk.bf16.gmra.mxu2 %vm683_vm1, %v1224_v58 }
 0x1b4   : > { %898 = vmatpush.bf16.msra.mxu1 %v1227_v61  ;;  %1283 = vmatpush.bf16.msra.mxu3 %v1227_v61 }
 0x1b8   : > { %899 = vmatpush.bf16.msra.mxu1 %v1226_v62  ;;  %1284 = vmatpush.bf16.msra.mxu3 %v1226_v62 }
 0x1bc   : > { %900 = vmatpush.bf16.msra.mxu1 %v1225_v63  ;;  %1285 = vmatpush.bf16.msra.mxu3 %v1225_v63 }
 0x1c2   : > { %1162 = vmatmul.msk.bf16.gmra.mxu0 %vm683_vm1, %v1219_v50 }
 0x1d2   : > { %1163 = vmatmul.msk.bf16.gmra.mxu0 %vm683_vm1, %v1220_v51  ;;  %v1269_v51 = vld [vmem:[%s1517_s24 + $0x20] sm:$0xff]  }
 0x1d3   : > { %v1252_v54 = vunpack.c.l.bf16 %v1269_v51  ;;  %v1253_v56 = vunpack.c.h.bf16 %v1269_v51 }
 0x1e2   : > { %1164 = vmatmul.msk.bf16.gmra.mxu0 %vm683_vm1, %v1221_v57 }
 0x1f2   : > { %1165 = vmatmul.msk.bf16.gmra.mxu0 %vm683_vm1, %v1222_v59 }
 0x21f   : > { %v717_v0 = vpop.f32.mrf.mxu0 }
 0x220   : > { %v718_v2 = vadd.f32 %v1594_v1, %v717_v0  ;;  %v1270_v0 = vld [vmem:[%s1517_s24 + $0x28] sm:$0xff]  }
 0x222   : > { %v757_v5 = vmax.f32 %v718_v2, 0.0 }
 0x224   : > { %v805_v10 = vmul.f32 %v1236_v6, %v757_v5  ;;  %v1257_v6 = vunpack.c.h.bf16 %v1270_v0 }
 0x225   : > { %v747_v62 = vpop.f32.mrf.mxu2 }
 0x227   : > { %v719_v4 = vpop.f32.mrf.mxu0 }
 0x228   : > { %v720_v7 = vadd.f32 %v1594_v1, %v719_v4  ;;  %v1256_v4 = vunpack.c.l.bf16 %v1270_v0 }
 0x22a   : > { %v758_v9 = vmax.f32 %v720_v7, 0.0 }
 0x22c   : > { %v806_v11 = vmul.f32 %v1237_v8, %v758_v9 }
 0x22d   : > { %v749_v8 = vpop.f32.mrf.mxu2 }
 0x22e   : > { %v821_v12 = vpack.c.bf16 %v806_v11, %v805_v10 }
 0x22f   : > { %v722_v13 = vpop.f32.mrf.mxu0 }
 0x230   : > { %901 = vmatmul.bf16.vlgmr.msra.gmra.mxu1 %v821_v12  ;;  %v723_v14 = vadd.f32 %v1594_v1, %v722_v13  ;;  %v748_v12 = vadd.f32 %v1594_v1, %v747_v62  ;;  %v750_v13 = vadd.f32 %v1594_v1, %v749_v8 }
 0x232   : > { %v759_v17 = vmax.f32 %v723_v14, 0.0  ;;  %v1271_v14 = vld [vmem:[%s1517_s24 + $0x30] sm:$0xff]  }
 0x234   : > { %v807_v22 = vmul.f32 %v1240_v18, %v759_v17  ;;  %v1260_v17 = vunpack.c.l.bf16 %v1271_v14  ;;  %v770_v18 = vmax.f32 %v750_v13, 0.0 }
 0x235   : > { %v752_v15 = vpop.f32.mrf.mxu2 }
 0x237   : > { %v724_v16 = vpop.f32.mrf.mxu0 }
 0x238   : > { %v725_v19 = vadd.f32 %v1594_v1, %v724_v16  ;;  %v769_v16 = vmax.f32 %v748_v12, 0.0 }
 0x23a   : > { %v760_v21 = vmax.f32 %v725_v19, 0.0  ;;  %v1261_v19 = vunpack.c.h.bf16 %v1271_v14 }
 0x23c   : > { %v808_v23 = vmul.f32 %v1241_v20, %v760_v21  ;;  %v817_v20 = vmul.f32 %v1260_v17, %v769_v16  ;;  %v818_v21 = vmul.f32 %v1261_v19, %v770_v18 }
 0x23e   : > { %v822_v24 = vpack.c.bf16 %v808_v23, %v807_v22  ;;  %v827_v22 = vpack.c.bf16 %v818_v21, %v817_v20  ;;  %v754_v23 = vpop.f32.mrf.mxu2 }
 0x23f   : > { %v727_v25 = vpop.f32.mrf.mxu0 }
 0x240   : > { %906 = vmatmul.bf16.gmra.mxu1 %v822_v24  ;;  %v728_v26 = vadd.f32 %v1594_v1, %v727_v25  ;;  %v753_v24 = vadd.f32 %v1594_v1, %v752_v15  ;;  %v755_v25 = vadd.f32 %v1594_v1, %v754_v23 }
 0x242   : > { %v761_v29 = vmax.f32 %v728_v26, 0.0  ;;  %v1272_v26 = vld [vmem:[%s1517_s24 + $0x38] sm:$0xff]   ;;  %v771_v27 = vmax.f32 %v753_v24, 0.0 }
 0x244   : > { %v809_v34 = vmul.f32 %v1244_v30, %v761_v29  ;;  %v772_v29 = vmax.f32 %v755_v25, 0.0  ;;  %v1265_v30 = vunpack.c.h.bf16 %v1272_v26 }
 0x247   : > { %v729_v28 = vpop.f32.mrf.mxu0 }
 0x248   : > { %v730_v31 = vadd.f32 %v1594_v1, %v729_v28  ;;  %v1264_v28 = vunpack.c.l.bf16 %v1272_v26 }
 0x24a   : > { %v762_v33 = vmax.f32 %v730_v31, 0.0  ;;  %v819_v31 = vmul.f32 %v1264_v28, %v771_v27 }
 0x24c   : > { %v810_v35 = vmul.f32 %v1245_v32, %v762_v33  ;;  %v820_v32 = vmul.f32 %v1265_v30, %v772_v29 }
 0x24e   : > { %v823_v36 = vpack.c.bf16 %v810_v35, %v809_v34  ;;  %v828_v33 = vpack.c.bf16 %v820_v32, %v819_v31 }
 0x24f   : > { %v732_v37 = vpop.f32.mrf.mxu0 }
 0x250   : > { %911 = vmatmul.bf16.gmra.mxu1 %v823_v36  ;;  %v733_v38 = vadd.f32 %v1594_v1, %v732_v37 }
 0x252   : > { %v763_v41 = vmax.f32 %v733_v38, 0.0 }
 0x254   : > { %v811_v46 = vmul.f32 %v1248_v42, %v763_v41 }
 0x257   : > { %v734_v40 = vpop.f32.mrf.mxu0 }
 0x258   : > { %v735_v43 = vadd.f32 %v1594_v1, %v734_v40 }
 0x25a   : > { %v764_v45 = vmax.f32 %v735_v43, 0.0 }
 0x25c   : > { %v812_v47 = vmul.f32 %v1249_v44, %v764_v45 }
 0x25e   : > { %v824_v48 = vpack.c.bf16 %v812_v47, %v811_v46 }
 0x25f   : > { %v737_v49 = vpop.f32.mrf.mxu0 }
 0x260   : > { %916 = vmatmul.bf16.gmra.mxu1 %v824_v48  ;;  %v738_v50 = vadd.f32 %v1594_v1, %v737_v49 }
 0x262   : > { %v765_v53 = vmax.f32 %v738_v50, 0.0 }
 0x264   : > { %v813_v58 = vmul.f32 %v1252_v54, %v765_v53 }
 0x267   : > { %v739_v52 = vpop.f32.mrf.mxu0 }
 0x268   : > { %v740_v55 = vadd.f32 %v1594_v1, %v739_v52 }
 0x26a   : > { %v766_v57 = vmax.f32 %v740_v55, 0.0 }
 0x26c   : > { %v814_v59 = vmul.f32 %v1253_v56, %v766_v57  ;;  %v1233_v57 = vld [vmem:[%s348_s11] sm:$0xff] }
 0x26e   : > { %v825_v60 = vpack.c.bf16 %v814_v59, %v813_v58  ;;  %v942_v58 = vld [vmem:[%s1662_s7] sm:$0xff] }
 0x26f   : > { %v742_v61 = vpop.f32.mrf.mxu0 }
 0x270   : > { %921 = vmatmul.bf16.vlgmr.msra.gmra.mxu3 %v825_v60  ;;  %v743_v63 = vadd.f32 %v1594_v1, %v742_v61  ;;  %v943_v61 = vld [vmem:[%s1662_s7 + $0x8] sm:$0xff] }
 0x272   : > { %v767_v3 = vmax.f32 %v743_v63, 0.0 }
 0x274   : > { %v815_v9 = vmul.f32 %v1256_v4, %v767_v3 }
 0x277   : > { %v744_v2 = vpop.f32.mrf.mxu0 }
 0x278   : > { %v745_v5 = vadd.f32 %v1594_v1, %v744_v2 }
 0x27a   : > { %v768_v7 = vmax.f32 %v745_v5, 0.0 }
 0x27c   : > { %v816_v10 = vmul.f32 %v1257_v6, %v768_v7 }
 0x27e   : > { %v826_v11 = vpack.c.bf16 %v816_v10, %v815_v9 }
 0x280   : > { %926 = vmatmul.bf16.gmra.mxu3 %v826_v11 }
 0x290   : > { %931 = vmatmul.bf16.gmra.mxu3 %v827_v22 }
 0x2a0   : > { %936 = vmatmul.bf16.gmra.mxu3 %v828_v33 }
 0x2ad   : > { %v902_v34 = vpop.f32.mrf.mxu1 }
 0x2b5   : > { %v904_v37 = vpop.f32.mrf.mxu1 }
 0x2b6   : > { %v946_v56 = vpack.c.bf16 %v904_v37, %v902_v34 }
 0x2bd   : > { %v907_v39 = vpop.f32.mrf.mxu1 }
 0x2c5   : > { %v909_v41 = vpop.f32.mrf.mxu1 }
 0x2c6   : > { %v947_v55 = vpack.c.bf16 %v909_v41, %v907_v39 }
 0x2cd   : > { %v912_v43 = vpop.f32.mrf.mxu1 }
 0x2d5   : > { %v914_v45 = vpop.f32.mrf.mxu1 }
 0x2d6   : > { %v948_v54 = vpack.c.bf16 %v914_v45, %v912_v43 }
 0x2dd   : > { %v917_v48 = vpop.f32.mrf.mxu1 }
 0x2e5   : > { %v919_v52 = vpop.f32.mrf.mxu1 }
 0x2e6   : > { %v949_v53 = vpack.c.bf16 %v919_v52, %v917_v48 }
 0x2f3   : > { %v922_v35 = vpop.f32.mrf.mxu3 }
 0x2fb   : > { %v924_v36 = vpop.f32.mrf.mxu3 }
 0x2fc   : > { %v950_v51 = vpack.c.bf16 %v924_v36, %v922_v35 }
 0x303   : > { %v927_v38 = vpop.f32.mrf.mxu3 }
 0x30b   : > { %v929_v40 = vpop.f32.mrf.mxu3 }
 0x30c   : > { %v951_v50 = vpack.c.bf16 %v929_v40, %v927_v38 }
 0x313   : > { %v932_v42 = vpop.f32.mrf.mxu3 }
 0x31b   : > { %v934_v1 = vpop.f32.mrf.mxu3 }
 0x31c   : > { %v952_v49 = vpack.c.bf16 %v934_v1, %v932_v42 }
 0x323   : > { %v937_v44 = vpop.f32.mrf.mxu3 }
 0x32b   : > { %v939_v46 = vpop.f32.mrf.mxu3 }
 0x32c   : > { %v953_v47 = vpack.c.bf16 %v939_v46, %v937_v44 }
 0x32e   : > { %960 = vmatpush.bf16.msrb.mxu2 %v953_v47 }
 0x332   : > { %961 = vmatpush.bf16.msrb.mxu2 %v952_v49 }
 0x336   : > { %962 = vmatpush.bf16.msrb.mxu2 %v951_v50 }
 0x33a   : > { %963 = vmatpush.bf16.msrb.mxu2 %v950_v51 }
 0x33e   : > { %964 = vmatpush.bf16.msrb.mxu2 %v949_v53 }
 0x342   : > { %965 = vmatpush.bf16.msrb.mxu2 %v948_v54 }
 0x346   : > { %966 = vmatpush.bf16.msrb.mxu2 %v947_v55 }
 0x34a   : > { %967 = vmatpush.bf16.msrb.mxu2 %v946_v56 }
 0x34d   : > { %968 = vmatmul.bf16.vlgmr.msrb.gmra.mxu2 %v1233_v57 }
 0x3d0   : > { %v969_v59 = vpop.f32.mrf.mxu2 }
 0x3d1   : > { %v974_v60 = vadd.f32 %v969_v59, %v942_v58 }
 0x3d3   : > { %976 = vst [vmem:[%s1662_s7] sm:$0xff] %v974_v60 }
 0x3d8   : > { %v971_v62 = vpop.f32.mrf.mxu2 }
 0x3d9   : > { %v975_v63 = vadd.f32 %v971_v62, %v943_v61 }
 0x3db   : > { %977 = vst [vmem:[%s1662_s7 + $0x8] sm:$0xff] %v975_v63 }
 0x3dc PF: > { %s17_s30 = sadd.s32 1, %s1399_s30   ;;  %s1665_s24 = smov %s1379_s25 }
 0x3dd   : > { %p14_p2 = scmp.ge.s32.totalorder %s17_s30, 6   ;;  %s1666_s25 = smov %s1492_s12 }
 0x3de   : > { %s1667_s26 = smov %s1391_s28  ;;  %s1668_s27 = smov %s1395_s29 }
 0x3df   : > { %s1669_s28 = smov %s1672_s8  ;;  %s1670_s29 = smov %s1676_s9 }
 0x3e0   :  { %16 = sbr.rel (!%p14_p2) target bundleno = 6 (0x6), region = 145 }

</bundles_post_ra>
